<compile_context>
chip_gen: v7x
topology: tpu7x:2x2x1
jax: 0.10.0
libtpu: 0.0.40
codegen_flags: <defaults>
</compile_context>

<pallas_src>
import functools

import jax
import jax.numpy as jnp
from jax import lax
from jax.experimental import pallas as pl
from jax.experimental.pallas import tpu as pltpu


LANE = 128  # TPU vreg lane width; all feature dims are padded to a multiple of this.


# ----------------------------- padding helpers (host-side, one-time) -----------------------------

def _round_up(x, m):
    return (x + m - 1) // m * m


def _pad_last(x, target):
    pads = [(0, 0)] * (x.ndim - 1) + [(0, target - x.shape[-1])]
    return jnp.pad(x, pads)


def _pad_blocked(w, rb, cb, rp, cp):
    """[nr*rb, nc*cb] -> [nr*rp, nc*cp]; each (rb, cb) sub-block zero-padded to (rp, cp).

    Keeps per-tap / per-gate weight blocks aligned to 128-lane slots so in-kernel slices
    of the padded activations are lane-aligned.
    """
    nr, nc = w.shape[0] // rb, w.shape[1] // cb
    w4 = w.reshape(nr, rb, nc, cb)
    out = jnp.zeros((nr, rp, nc, cp), w.dtype)
    out = out.at[:, :rb, :, :cb].set(w4)
    return out.reshape(nr * rp, nc * cp)


# ----------------------------- fused Seq2Seq kernel -----------------------------

def _make_seq2seq_kernel(n_layers, k, B, S, T, Hp):
    """One fused kernel: encoder proj + pool, then every QRNN layer (+ attention) in VMEM."""

    def kernel(*refs):
        enc_x_ref, enc_w_ref, enc_b_ref, dec_x_ref = refs[:4]
        conv_refs = refs[4:4 + 2 * n_layers]                       # (w_conv, b_conv) per layer
        w_att_ref, b_att_ref = refs[4 + 2 * n_layers:4 + 2 * n_layers + 2]
        c_out_ref, h_out_ref = refs[-2], refs[-1]

        # -------- Encoder: tanh(emb @ W + b) memory + mean-pooled cell state (never leaves VMEM) --------
        Ep = enc_x_ref.shape[-1]
        e = enc_x_ref[...].reshape(B * S, Ep).astype(jnp.bfloat16)   # bf16 MXU operand
        mem = jnp.tanh(
            jnp.dot(e, enc_w_ref[...], preferred_element_type=jnp.float32)
            + enc_b_ref[...]).reshape(B, S, Hp)                      # [B,S,Hp] f32 encoder memory
        c0 = jnp.mean(mem, axis=1)                                   # [B,Hp] pooled cell state

        # -------- Decoder: all layers fused, activations stay as SSA values --------
        x = dec_x_ref[...]                                           # [B,T,Dp] f32
        for li in range(n_layers):
            w_conv_ref, b_conv_ref = conv_refs[2 * li], conv_refs[2 * li + 1]
            Dp = x.shape[-1]
            x2 = x.reshape(B * T, Dp)                                # batch folded into rows

            # ---- causal conv taps: sublane roll (XLU) + causal zero-mask (1 VPU select) ----
            # Row r = b*T + t; rolling by s pulls x[t-s]; rows with t < s are zeroed, which
            # also kills any cross-batch wrap-around.
            t_idx = lax.broadcasted_iota(jnp.int32, (B * T, Dp), 0) % T
            taps = []
            for j in range(k):
                s = k - 1 - j                                        # tap j reads x[t - s]
                if s == 0:
                    taps.append(x2)
                else:
                    xr = pltpu.roll(x2, shift=s, axis=0)
                    taps.append(jnp.where(t_idx >= s, xr, 0.0))
            x_cat = jnp.concatenate(taps, axis=-1)                   # [B*T, k*Dp]

            # ---- gate pre-activations: one MXU pass over the whole batch*time block ----
            gates = jnp.dot(x_cat.astype(jnp.bfloat16), w_conv_ref[...],
                            preferred_element_type=jnp.float32) + b_conv_ref[...]
            gates = gates.reshape(B, T, 3 * Hp)

            # ---- gate nonlinearities, vectorized over the whole block (EUP/VPU) ----
            z = jnp.tanh(gates[..., :Hp])                            # [B,T,Hp]
            f = jax.nn.sigmoid(gates[..., Hp:2 * Hp])
            o = jax.nn.sigmoid(gates[..., 2 * Hp:])

            # ---- fo-pooling: register-resident static unroll, one dense store at the end ----
            c_prev = c0                                              # same pooled state every layer
            c_rows = []
            for t in range(T):
                ft = f[:, t, :]
                c_prev = ft * c_prev + (1.0 - ft) * z[:, t, :]
                c_rows.append(c_prev)
            c_all = jnp.stack(c_rows, axis=1)                        # [B,T,Hp]

            if li == n_layers - 1:
                # ---- attention over encoder memory (last layer only), bf16 MXU operands ----
                mem_bf = mem.astype(jnp.bfloat16)
                scores = jnp.einsum('btd,bsd->bts', c_all.astype(jnp.bfloat16),
                                    mem_bf, preferred_element_type=jnp.float32)
                scores = scores - jnp.max(scores, axis=-1, keepdims=True)
                p = jnp.exp(scores)
                alpha = p * pl.reciprocal(jnp.sum(p, axis=-1, keepdims=True),
                                          approx=True)
                ctx = jnp.einsum('bts,bsd->btd', alpha.astype(jnp.bfloat16),
                                 mem_bf, preferred_element_type=jnp.float32)
                # fused projection: [ctx | c] @ [w_k ; w_c] + b
                cat = jnp.concatenate([ctx, c_all], axis=-1).reshape(B * T, 2 * Hp)
                proj = (jnp.dot(cat.astype(jnp.bfloat16), w_att_ref[...],
                                preferred_element_type=jnp.float32)
                        + b_att_ref[...]).reshape(B, T, Hp)
                h = o * proj
            else:
                h = o * c_all                                        # zoneout/dropout identity (eval)

            c_out_ref[li] = c_all
            h_out_ref[li] = h
            x = h                                                    # next layer input stays in VMEM

    return kernel


def seq2seq_pallas(enc_x, enc_w, enc_b, dec_x, layers, *, kernel_size):
    """Single fused pallas_call for the whole encoder + decoder stack.

    enc_x: [B,S,Ep] f32, dec_x: [B,T,Ep] f32, weights pre-padded/bf16 per init_params.
    Returns (c_stack, h_stack), each [L,B,T,Hp] f32 (lane padding still attached).
    """
    B, S, _ = enc_x.shape
    _, T, _ = dec_x.shape
    Hp = enc_w.shape[1]
    L = len(layers)

    args = [enc_x, enc_w, enc_b, dec_x]
    for lp in layers:
        args += [lp["w_conv"], lp["b_conv"]]
    args += [layers[-1]["w_att"], layers[-1]["b_att"]]

    # TODO(synk): when scaling to BERT-like S/H/B, tile the encoder memory over a grid and
    #             set vmem_limit_bytes explicitly; at these toy sizes whole-VMEM is fine.
    vmem = pl.BlockSpec(memory_space=pltpu.MemorySpace.VMEM)
    kernel = _make_seq2seq_kernel(L, kernel_size, B, S, T, Hp)
    return pl.pallas_call(
        kernel,
        in_specs=[vmem] * len(args),
        out_specs=(vmem, vmem),
        out_shape=(jax.ShapeDtypeStruct((L, B, T, Hp), jnp.float32),
                   jax.ShapeDtypeStruct((L, B, T, Hp), jnp.float32)),
    )(*args)


# ----------------------------- params -----------------------------

def init_params(key, src_vocab, tgt_vocab, n_layers, kernel_size, hidden, emb):
    Hp = _round_up(hidden, LANE)
    Ep = _round_up(emb, LANE)
    ks = list(jax.random.split(key, 3 + 3 * n_layers))
    scale = 0.1
    enc_emb = scale * jax.random.normal(ks[0], (src_vocab, emb), jnp.float32)
    enc_w = scale * jax.random.normal(ks[1], (emb, hidden), jnp.float32)
    dec_emb = scale * jax.random.normal(ks[2], (tgt_vocab, emb), jnp.float32)
    params = {
        "enc_emb": _pad_last(enc_emb, Ep),                                   # [V, Ep] f32
        "enc_w": _pad_blocked(enc_w, emb, hidden, Ep, Hp).astype(jnp.bfloat16),
        "enc_b": jnp.zeros((1, Hp), jnp.float32),
        "dec_emb": _pad_last(dec_emb, Ep),                                   # [V, Ep] f32
        "layers": [],
    }
    ki = 3
    for li in range(n_layers):
        d_in, d_in_pad = (emb, Ep) if li == 0 else (hidden, Hp)
        w_conv = scale * jax.random.normal(
            ks[ki], (kernel_size * d_in, 3 * hidden), jnp.float32)
        layer = {
            # per-tap / per-gate blocks padded to 128-lane slots, bf16 MXU operands
            "w_conv": _pad_blocked(w_conv, d_in, hidden, d_in_pad, Hp).astype(jnp.bfloat16),
            "b_conv": jnp.zeros((1, 3 * Hp), jnp.float32),
        }
        if li == n_layers - 1:
            w_k = scale * jax.random.normal(ks[ki + 1], (hidden, hidden), jnp.float32)
            w_c = scale * jax.random.normal(ks[ki + 2], (hidden, hidden), jnp.float32)
            # fused attention projection weight: [w_k ; w_c] stacked on the K axis
            layer["w_att"] = _pad_blocked(jnp.concatenate([w_k, w_c], axis=0),
                                          hidden, hidden, Hp, Hp).astype(jnp.bfloat16)
            layer["b_att"] = jnp.zeros((1, Hp), jnp.float32)
        params["layers"].append(layer)
        ki += 3
    return params


# ----------------------------- model (glue) -----------------------------

@functools.partial(jax.jit, static_argnames=("n_layers", "kernel_size", "hidden"))
def seq2seq_forward(params, input_ids, decoder_input_ids, *,
                    n_layers, kernel_size, hidden):
    # ----- Encoder embedding (synthetic stand-in for BERT) + decoder embedding (XLA gathers) -----
    # TODO(synk): pretrained 'cl-tohoku/bert-base-japanese' encoder/tokenizer replaced by a
    #             deterministic synthetic embedding + tanh(linear) projection (int32 token ids).
    enc_x = jnp.take(params["enc_emb"], input_ids, axis=0)          # [B, S, Ep]
    dec_x = jnp.take(params["dec_emb"], decoder_input_ids, axis=0)  # [B, T, Ep]

    # ----- One fused Pallas call for the entire encoder + QRNN decoder stack -----
    c_stack, h_stack = seq2seq_pallas(
        enc_x, params["enc_w"], params["enc_b"], dec_x, params["layers"],
        kernel_size=kernel_size)

    # Strip lane padding once on the stacked outputs, then split per layer.
    c_stack = c_stack[..., :hidden]
    h_stack = h_stack[..., :hidden]
    c_list = [c_stack[i] for i in range(n_layers)]
    h_list = [h_stack[i] for i in range(n_layers)]
    return c_list, h_list


# ----------------------------- main -----------------------------

if __name__ == "__main__":
    SRC_VOCAB = 60
    TGT_VOCAB = 50
    N_LAYERS = 2
    KERNEL_SIZE = 2
    HIDDEN = 32
    EMB = 32
    B, S_ENC, T_DEC = 2, 8, 8

    key = jax.random.PRNGKey(0)
    kp, kin, kdec = jax.random.split(key, 3)

    params = init_params(kp, SRC_VOCAB, TGT_VOCAB, N_LAYERS, KERNEL_SIZE,
                         HIDDEN, EMB)
    input_ids = jax.random.randint(kin, (B, S_ENC), 0, SRC_VOCAB, dtype=jnp.int32)
    decoder_input_ids = jax.random.randint(kdec, (B, T_DEC), 0, TGT_VOCAB,
                                           dtype=jnp.int32)

    cell_states, hidden_states = seq2seq_forward(
        params, input_ids, decoder_input_ids,
        n_layers=N_LAYERS, kernel_size=KERNEL_SIZE, hidden=HIDDEN)

    jax.block_until_ready(cell_states)
    jax.block_until_ready(hidden_states)
    assert cell_states[-1].shape == (B, T_DEC, HIDDEN)
    assert hidden_states[-1].shape == (B, T_DEC, HIDDEN)
    assert all(bool(jnp.all(jnp.isfinite(h))) for h in hidden_states)
    assert all(bool(jnp.all(jnp.isfinite(c))) for c in cell_states)
    print("KERNEL_OK")
</pallas_src>

<mosaic_0001>
module attributes {stable_mosaic.version = 11 : i64} {
  func.func @kernel(%arg0: memref<2x8x128xf32, #tpu.memory_space<vmem>>, %arg1: memref<128x128xbf16, #tpu.memory_space<vmem>>, %arg2: memref<1x128xf32, #tpu.memory_space<vmem>>, %arg3: memref<2x8x128xf32, #tpu.memory_space<vmem>>, %arg4: memref<256x384xbf16, #tpu.memory_space<vmem>>, %arg5: memref<1x384xf32, #tpu.memory_space<vmem>>, %arg6: memref<256x384xbf16, #tpu.memory_space<vmem>>, %arg7: memref<1x384xf32, #tpu.memory_space<vmem>>, %arg8: memref<256x128xbf16, #tpu.memory_space<vmem>>, %arg9: memref<1x128xf32, #tpu.memory_space<vmem>>, %arg10: memref<2x2x8x128xf32, #tpu.memory_space<vmem>>, %arg11: memref<2x2x8x128xf32, #tpu.memory_space<vmem>>) attributes {dimension_semantics = [], scalar_prefetch = 0 : i64, scratch_operands = 0 : i64, tpu.core_type = #tpu.core_type<tc>} {
    %c0 = arith.constant 0 : index
    %c0_0 = arith.constant 0 : index
    %c0_1 = arith.constant 0 : index
    %0 = vector.load %arg0[%c0, %c0_0, %c0_1] : memref<2x8x128xf32, #tpu.memory_space<vmem>>, vector<2x8x128xf32>
    %1 = vector.shape_cast %0 : vector<2x8x128xf32> to vector<16x128xf32>
    %2 = arith.truncf %1 : vector<16x128xf32> to vector<16x128xbf16>
    %c0_2 = arith.constant 0 : index
    %c0_3 = arith.constant 0 : index
    %3 = vector.load %arg1[%c0_2, %c0_3] : memref<128x128xbf16, #tpu.memory_space<vmem>>, vector<128x128xbf16>
    %cst = arith.constant dense<0.000000e+00> : vector<16x128xf32>
    %4 = tpu.matmul %2, %3, %cst {dimension_numbers = #tpu.dot_dimension_numbers<[1], [0], [0], [1], [0, 0, 1, 1], [], []>} : vector<16x128xbf16>, vector<128x128xbf16>, vector<16x128xf32> -> vector<16x128xf32>
    %c0_4 = arith.constant 0 : index
    %c0_5 = arith.constant 0 : index
    %5 = vector.load %arg2[%c0_4, %c0_5] : memref<1x128xf32, #tpu.memory_space<vmem>>, vector<1x128xf32>
    %6 = vector.broadcast %5 : vector<1x128xf32> to vector<16x128xf32>
    %7 = arith.addf %4, %6 : vector<16x128xf32>
    %8 = math.tanh %7 : vector<16x128xf32>
    %9 = vector.shape_cast %8 : vector<16x128xf32> to vector<2x8x128xf32>
    %cst_6 = arith.constant dense<0.000000e+00> : vector<2x128xf32>
    %10 = vector.multi_reduction <add>, %9, %cst_6 [1] : vector<2x8x128xf32> to vector<2x128xf32>
    %cst_7 = arith.constant 8.000000e+00 : f32
    %11 = vector.broadcast %cst_7 : f32 to vector<2x128xf32>
    %12 = arith.divf %10, %11 : vector<2x128xf32>
    %c0_8 = arith.constant 0 : index
    %c0_9 = arith.constant 0 : index
    %c0_10 = arith.constant 0 : index
    %13 = vector.load %arg3[%c0_8, %c0_9, %c0_10] : memref<2x8x128xf32, #tpu.memory_space<vmem>>, vector<2x8x128xf32>
    %14 = vector.shape_cast %13 : vector<2x8x128xf32> to vector<16x128xf32>
    %15 = tpu.iota {dimensions = array<i32: 0>} : vector<16x128xi32>
    %c8_i32 = arith.constant 8 : i32
    %c0_i32 = arith.constant 0 : i32
    %16 = arith.cmpi eq, %c8_i32, %c0_i32 : i32
    %c1_i32 = arith.constant 1 : i32
    %17 = arith.select %16, %c1_i32, %c8_i32 : i32
    %18 = vector.broadcast %17 : i32 to vector<16x128xi32>
    %19 = arith.remsi %15, %18 : vector<16x128xi32>
    %c0_i32_11 = arith.constant 0 : i32
    %20 = vector.broadcast %c0_i32_11 : i32 to vector<16x128xi32>
    %21 = arith.cmpi ne, %19, %20 : vector<16x128xi32>
    %c0_i32_12 = arith.constant 0 : i32
    %22 = vector.broadcast %c0_i32_12 : i32 to vector<16x128xi32>
    %23 = arith.cmpi slt, %19, %22 : vector<16x128xi32>
    %c0_i32_13 = arith.constant 0 : i32
    %24 = arith.cmpi slt, %17, %c0_i32_13 : i32
    %25 = vector.broadcast %24 : i1 to vector<16x128xi1>
    %26 = vector.broadcast %25 : vector<16x128xi1> to vector<16x128xi1>
    %27 = arith.xori %23, %26 : vector<16x128xi1>
    %28 = arith.andi %27, %21 : vector<16x128xi1>
    %29 = vector.broadcast %17 : i32 to vector<16x128xi32>
    %30 = arith.addi %19, %29 : vector<16x128xi32>
    %31 = arith.select %28, %30, %19 : vector<16x128xi1>, vector<16x128xi32>
    %c1_i32_14 = arith.constant 1 : i32
    %32 = tpu.dynamic_rotate %14 by %c1_i32_14 dim 0 : vector<16x128xf32>, i32 -> vector<16x128xf32>
    %c1_i32_15 = arith.constant 1 : i32
    %33 = vector.broadcast %c1_i32_15 : i32 to vector<16x128xi32>
    %34 = arith.cmpi sge, %31, %33 : vector<16x128xi32>
    %cst_16 = arith.constant 0.000000e+00 : f32
    %35 = vector.broadcast %cst_16 : f32 to vector<16x128xf32>
    %36 = arith.select %34, %32, %35 : vector<16x128xi1>, vector<16x128xf32>
    %37 = tpu.concatenate %36, %14 in 1 : vector<16x128xf32>, vector<16x128xf32> -> vector<16x256xf32>
    %38 = arith.truncf %37 : vector<16x256xf32> to vector<16x256xbf16>
    %c0_17 = arith.constant 0 : index
    %c0_18 = arith.constant 0 : index
    %39 = vector.load %arg4[%c0_17, %c0_18] : memref<256x384xbf16, #tpu.memory_space<vmem>>, vector<256x384xbf16>
    %cst_19 = arith.constant dense<0.000000e+00> : vector<16x384xf32>
    %40 = tpu.matmul %38, %39, %cst_19 {dimension_numbers = #tpu.dot_dimension_numbers<[1], [0], [0], [1], [0, 0, 1, 1], [], []>} : vector<16x256xbf16>, vector<256x384xbf16>, vector<16x384xf32> -> vector<16x384xf32>
    %c0_20 = arith.constant 0 : index
    %c0_21 = arith.constant 0 : index
    %41 = vector.load %arg5[%c0_20, %c0_21] : memref<1x384xf32, #tpu.memory_space<vmem>>, vector<1x384xf32>
    %42 = vector.broadcast %41 : vector<1x384xf32> to vector<16x384xf32>
    %43 = arith.addf %40, %42 : vector<16x384xf32>
    %44 = vector.shape_cast %43 : vector<16x384xf32> to vector<2x8x384xf32>
    %45 = vector.extract_strided_slice %44 {offsets = [0, 0, 0], sizes = [2, 8, 128], strides = [1, 1, 1]} : vector<2x8x384xf32> to vector<2x8x128xf32>
    %46 = math.tanh %45 : vector<2x8x128xf32>
    %47 = vector.extract_strided_slice %44 {offsets = [0, 0, 128], sizes = [2, 8, 128], strides = [1, 1, 1]} : vector<2x8x384xf32> to vector<2x8x128xf32>
    %48 = arith.negf %47 : vector<2x8x128xf32>
    %49 = math.exp %48 : vector<2x8x128xf32>
    %cst_22 = arith.constant 1.000000e+00 : f32
    %50 = vector.broadcast %cst_22 : f32 to vector<2x8x128xf32>
    %51 = arith.addf %50, %49 : vector<2x8x128xf32>
    %52 = arith.divf %50, %51 : vector<2x8x128xf32>
    %53 = vector.extract_strided_slice %44 {offsets = [0, 0, 256], sizes = [2, 8, 128], strides = [1, 1, 1]} : vector<2x8x384xf32> to vector<2x8x128xf32>
    %54 = arith.negf %53 : vector<2x8x128xf32>
    %55 = math.exp %54 : vector<2x8x128xf32>
    %cst_23 = arith.constant 1.000000e+00 : f32
    %56 = vector.broadcast %cst_23 : f32 to vector<2x8x128xf32>
    %57 = arith.addf %56, %55 : vector<2x8x128xf32>
    %58 = arith.divf %56, %57 : vector<2x8x128xf32>
    %59 = vector.extract_strided_slice %52 {offsets = [0, 0, 0], sizes = [2, 1, 128], strides = [1, 1, 1]} : vector<2x8x128xf32> to vector<2x1x128xf32>
    %60 = vector.shape_cast %59 : vector<2x1x128xf32> to vector<2x128xf32>
    %61 = arith.mulf %60, %12 : vector<2x128xf32>
    %cst_24 = arith.constant 1.000000e+00 : f32
    %62 = vector.broadcast %cst_24 : f32 to vector<2x128xf32>
    %63 = arith.subf %62, %60 : vector<2x128xf32>
    %64 = vector.extract_strided_slice %46 {offsets = [0, 0, 0], sizes = [2, 1, 128], strides = [1, 1, 1]} : vector<2x8x128xf32> to vector<2x1x128xf32>
    %65 = vector.shape_cast %64 : vector<2x1x128xf32> to vector<2x128xf32>
    %66 = arith.mulf %63, %65 : vector<2x128xf32>
    %67 = arith.addf %61, %66 : vector<2x128xf32>
    %68 = vector.extract_strided_slice %52 {offsets = [0, 1, 0], sizes = [2, 1, 128], strides = [1, 1, 1]} : vector<2x8x128xf32> to vector<2x1x128xf32>
    %69 = vector.shape_cast %68 : vector<2x1x128xf32> to vector<2x128xf32>
    %70 = arith.mulf %69, %67 : vector<2x128xf32>
    %cst_25 = arith.constant 1.000000e+00 : f32
    %71 = vector.broadcast %cst_25 : f32 to vector<2x128xf32>
    %72 = arith.subf %71, %69 : vector<2x128xf32>
    %73 = vector.extract_strided_slice %46 {offsets = [0, 1, 0], sizes = [2, 1, 128], strides = [1, 1, 1]} : vector<2x8x128xf32> to vector<2x1x128xf32>
    %74 = vector.shape_cast %73 : vector<2x1x128xf32> to vector<2x128xf32>
    %75 = arith.mulf %72, %74 : vector<2x128xf32>
    %76 = arith.addf %70, %75 : vector<2x128xf32>
    %77 = vector.extract_strided_slice %52 {offsets = [0, 2, 0], sizes = [2, 1, 128], strides = [1, 1, 1]} : vector<2x8x128xf32> to vector<2x1x128xf32>
    %78 = vector.shape_cast %77 : vector<2x1x128xf32> to vector<2x128xf32>
    %79 = arith.mulf %78, %76 : vector<2x128xf32>
    %cst_26 = arith.constant 1.000000e+00 : f32
    %80 = vector.broadcast %cst_26 : f32 to vector<2x128xf32>
    %81 = arith.subf %80, %78 : vector<2x128xf32>
    %82 = vector.extract_strided_slice %46 {offsets = [0, 2, 0], sizes = [2, 1, 128], strides = [1, 1, 1]} : vector<2x8x128xf32> to vector<2x1x128xf32>
    %83 = vector.shape_cast %82 : vector<2x1x128xf32> to vector<2x128xf32>
    %84 = arith.mulf %81, %83 : vector<2x128xf32>
    %85 = arith.addf %79, %84 : vector<2x128xf32>
    %86 = vector.extract_strided_slice %52 {offsets = [0, 3, 0], sizes = [2, 1, 128], strides = [1, 1, 1]} : vector<2x8x128xf32> to vector<2x1x128xf32>
    %87 = vector.shape_cast %86 : vector<2x1x128xf32> to vector<2x128xf32>
    %88 = arith.mulf %87, %85 : vector<2x128xf32>
    %cst_27 = arith.constant 1.000000e+00 : f32
    %89 = vector.broadcast %cst_27 : f32 to vector<2x128xf32>
    %90 = arith.subf %89, %87 : vector<2x128xf32>
    %91 = vector.extract_strided_slice %46 {offsets = [0, 3, 0], sizes = [2, 1, 128], strides = [1, 1, 1]} : vector<2x8x128xf32> to vector<2x1x128xf32>
    %92 = vector.shape_cast %91 : vector<2x1x128xf32> to vector<2x128xf32>
    %93 = arith.mulf %90, %92 : vector<2x128xf32>
    %94 = arith.addf %88, %93 : vector<2x128xf32>
    %95 = vector.extract_strided_slice %52 {offsets = [0, 4, 0], sizes = [2, 1, 128], strides = [1, 1, 1]} : vector<2x8x128xf32> to vector<2x1x128xf32>
    %96 = vector.shape_cast %95 : vector<2x1x128xf32> to vector<2x128xf32>
    %97 = arith.mulf %96, %94 : vector<2x128xf32>
    %cst_28 = arith.constant 1.000000e+00 : f32
    %98 = vector.broadcast %cst_28 : f32 to vector<2x128xf32>
    %99 = arith.subf %98, %96 : vector<2x128xf32>
    %100 = vector.extract_strided_slice %46 {offsets = [0, 4, 0], sizes = [2, 1, 128], strides = [1, 1, 1]} : vector<2x8x128xf32> to vector<2x1x128xf32>
    %101 = vector.shape_cast %100 : vector<2x1x128xf32> to vector<2x128xf32>
    %102 = arith.mulf %99, %101 : vector<2x128xf32>
    %103 = arith.addf %97, %102 : vector<2x128xf32>
    %104 = vector.extract_strided_slice %52 {offsets = [0, 5, 0], sizes = [2, 1, 128], strides = [1, 1, 1]} : vector<2x8x128xf32> to vector<2x1x128xf32>
    %105 = vector.shape_cast %104 : vector<2x1x128xf32> to vector<2x128xf32>
    %106 = arith.mulf %105, %103 : vector<2x128xf32>
    %cst_29 = arith.constant 1.000000e+00 : f32
    %107 = vector.broadcast %cst_29 : f32 to vector<2x128xf32>
    %108 = arith.subf %107, %105 : vector<2x128xf32>
    %109 = vector.extract_strided_slice %46 {offsets = [0, 5, 0], sizes = [2, 1, 128], strides = [1, 1, 1]} : vector<2x8x128xf32> to vector<2x1x128xf32>
    %110 = vector.shape_cast %109 : vector<2x1x128xf32> to vector<2x128xf32>
    %111 = arith.mulf %108, %110 : vector<2x128xf32>
    %112 = arith.addf %106, %111 : vector<2x128xf32>
    %113 = vector.extract_strided_slice %52 {offsets = [0, 6, 0], sizes = [2, 1, 128], strides = [1, 1, 1]} : vector<2x8x128xf32> to vector<2x1x128xf32>
    %114 = vector.shape_cast %113 : vector<2x1x128xf32> to vector<2x128xf32>
    %115 = arith.mulf %114, %112 : vector<2x128xf32>
    %cst_30 = arith.constant 1.000000e+00 : f32
    %116 = vector.broadcast %cst_30 : f32 to vector<2x128xf32>
    %117 = arith.subf %116, %114 : vector<2x128xf32>
    %118 = vector.extract_strided_slice %46 {offsets = [0, 6, 0], sizes = [2, 1, 128], strides = [1, 1, 1]} : vector<2x8x128xf32> to vector<2x1x128xf32>
    %119 = vector.shape_cast %118 : vector<2x1x128xf32> to vector<2x128xf32>
    %120 = arith.mulf %117, %119 : vector<2x128xf32>
    %121 = arith.addf %115, %120 : vector<2x128xf32>
    %122 = vector.extract_strided_slice %52 {offsets = [0, 7, 0], sizes = [2, 1, 128], strides = [1, 1, 1]} : vector<2x8x128xf32> to vector<2x1x128xf32>
    %123 = vector.shape_cast %122 : vector<2x1x128xf32> to vector<2x128xf32>
    %124 = arith.mulf %123, %121 : vector<2x128xf32>
    %cst_31 = arith.constant 1.000000e+00 : f32
    %125 = vector.broadcast %cst_31 : f32 to vector<2x128xf32>
    %126 = arith.subf %125, %123 : vector<2x128xf32>
    %127 = vector.extract_strided_slice %46 {offsets = [0, 7, 0], sizes = [2, 1, 128], strides = [1, 1, 1]} : vector<2x8x128xf32> to vector<2x1x128xf32>
    %128 = vector.shape_cast %127 : vector<2x1x128xf32> to vector<2x128xf32>
    %129 = arith.mulf %126, %128 : vector<2x128xf32>
    %130 = arith.addf %124, %129 : vector<2x128xf32>
    %131 = vector.shape_cast %67 : vector<2x128xf32> to vector<2x1x128xf32>
    %132 = vector.shape_cast %76 : vector<2x128xf32> to vector<2x1x128xf32>
    %133 = vector.shape_cast %85 : vector<2x128xf32> to vector<2x1x128xf32>
    %134 = vector.shape_cast %94 : vector<2x128xf32> to vector<2x1x128xf32>
    %135 = vector.shape_cast %103 : vector<2x128xf32> to vector<2x1x128xf32>
    %136 = vector.shape_cast %112 : vector<2x128xf32> to vector<2x1x128xf32>
    %137 = vector.shape_cast %121 : vector<2x128xf32> to vector<2x1x128xf32>
    %138 = vector.shape_cast %130 : vector<2x128xf32> to vector<2x1x128xf32>
    %139 = tpu.concatenate %131, %132, %133, %134, %135, %136, %137, %138 in 1 : vector<2x1x128xf32>, vector<2x1x128xf32>, vector<2x1x128xf32>, vector<2x1x128xf32>, vector<2x1x128xf32>, vector<2x1x128xf32>, vector<2x1x128xf32>, vector<2x1x128xf32> -> vector<2x8x128xf32>
    %140 = arith.mulf %58, %139 : vector<2x8x128xf32>
    %c0_32 = arith.constant 0 : index
    %c0_33 = arith.constant 0 : index
    %c0_34 = arith.constant 0 : index
    %c0_35 = arith.constant 0 : index
    %141 = vector.load %arg10[%c0_32, %c0_33, %c0_34, %c0_35] : memref<2x2x8x128xf32, #tpu.memory_space<vmem>>, vector<1x2x8x128xf32>
    %142 = vector.shape_cast %141 : vector<1x2x8x128xf32> to vector<2x8x128xf32>
    %143 = vector.shape_cast %139 : vector<2x8x128xf32> to vector<1x2x8x128xf32>
    tpu.vector_store %arg10[%c0_32, %c0_33, %c0_34, %c0_35], %143 {strides = array<i32>} : memref<2x2x8x128xf32, #tpu.memory_space<vmem>>, vector<1x2x8x128xf32>,
    %c0_36 = arith.constant 0 : index
    %c0_37 = arith.constant 0 : index
    %c0_38 = arith.constant 0 : index
    %c0_39 = arith.constant 0 : index
    %144 = vector.load %arg11[%c0_36, %c0_37, %c0_38, %c0_39] : memref<2x2x8x128xf32, #tpu.memory_space<vmem>>, vector<1x2x8x128xf32>
    %145 = vector.shape_cast %144 : vector<1x2x8x128xf32> to vector<2x8x128xf32>
    %146 = vector.shape_cast %140 : vector<2x8x128xf32> to vector<1x2x8x128xf32>
    tpu.vector_store %arg11[%c0_36, %c0_37, %c0_38, %c0_39], %146 {strides = array<i32>} : memref<2x2x8x128xf32, #tpu.memory_space<vmem>>, vector<1x2x8x128xf32>,
    %147 = vector.shape_cast %140 : vector<2x8x128xf32> to vector<16x128xf32>
    %148 = tpu.iota {dimensions = array<i32: 0>} : vector<16x128xi32>
    %c8_i32_40 = arith.constant 8 : i32
    %c0_i32_41 = arith.constant 0 : i32
    %149 = arith.cmpi eq, %c8_i32_40, %c0_i32_41 : i32
    %c1_i32_42 = arith.constant 1 : i32
    %150 = arith.select %149, %c1_i32_42, %c8_i32_40 : i32
    %151 = vector.broadcast %150 : i32 to vector<16x128xi32>
    %152 = arith.remsi %148, %151 : vector<16x128xi32>
    %c0_i32_43 = arith.constant 0 : i32
    %153 = vector.broadcast %c0_i32_43 : i32 to vector<16x128xi32>
    %154 = arith.cmpi ne, %152, %153 : vector<16x128xi32>
    %c0_i32_44 = arith.constant 0 : i32
    %155 = vector.broadcast %c0_i32_44 : i32 to vector<16x128xi32>
    %156 = arith.cmpi slt, %152, %155 : vector<16x128xi32>
    %c0_i32_45 = arith.constant 0 : i32
    %157 = arith.cmpi slt, %150, %c0_i32_45 : i32
    %158 = vector.broadcast %157 : i1 to vector<16x128xi1>
    %159 = vector.broadcast %158 : vector<16x128xi1> to vector<16x128xi1>
    %160 = arith.xori %156, %159 : vector<16x128xi1>
    %161 = arith.andi %160, %154 : vector<16x128xi1>
    %162 = vector.broadcast %150 : i32 to vector<16x128xi32>
    %163 = arith.addi %152, %162 : vector<16x128xi32>
    %164 = arith.select %161, %163, %152 : vector<16x128xi1>, vector<16x128xi32>
    %c1_i32_46 = arith.constant 1 : i32
    %165 = tpu.dynamic_rotate %147 by %c1_i32_46 dim 0 : vector<16x128xf32>, i32 -> vector<16x128xf32>
    %c1_i32_47 = arith.constant 1 : i32
    %166 = vector.broadcast %c1_i32_47 : i32 to vector<16x128xi32>
    %167 = arith.cmpi sge, %164, %166 : vector<16x128xi32>
    %cst_48 = arith.constant 0.000000e+00 : f32
    %168 = vector.broadcast %cst_48 : f32 to vector<16x128xf32>
    %169 = arith.select %167, %165, %168 : vector<16x128xi1>, vector<16x128xf32>
    %170 = tpu.concatenate %169, %147 in 1 : vector<16x128xf32>, vector<16x128xf32> -> vector<16x256xf32>
    %171 = arith.truncf %170 : vector<16x256xf32> to vector<16x256xbf16>
    %c0_49 = arith.constant 0 : index
    %c0_50 = arith.constant 0 : index
    %172 = vector.load %arg6[%c0_49, %c0_50] : memref<256x384xbf16, #tpu.memory_space<vmem>>, vector<256x384xbf16>
    %cst_51 = arith.constant dense<0.000000e+00> : vector<16x384xf32>
    %173 = tpu.matmul %171, %172, %cst_51 {dimension_numbers = #tpu.dot_dimension_numbers<[1], [0], [0], [1], [0, 0, 1, 1], [], []>} : vector<16x256xbf16>, vector<256x384xbf16>, vector<16x384xf32> -> vector<16x384xf32>
    %c0_52 = arith.constant 0 : index
    %c0_53 = arith.constant 0 : index
    %174 = vector.load %arg7[%c0_52, %c0_53] : memref<1x384xf32, #tpu.memory_space<vmem>>, vector<1x384xf32>
    %175 = vector.broadcast %174 : vector<1x384xf32> to vector<16x384xf32>
    %176 = arith.addf %173, %175 : vector<16x384xf32>
    %177 = vector.shape_cast %176 : vector<16x384xf32> to vector<2x8x384xf32>
    %178 = vector.extract_strided_slice %177 {offsets = [0, 0, 0], sizes = [2, 8, 128], strides = [1, 1, 1]} : vector<2x8x384xf32> to vector<2x8x128xf32>
    %179 = math.tanh %178 : vector<2x8x128xf32>
    %180 = vector.extract_strided_slice %177 {offsets = [0, 0, 128], sizes = [2, 8, 128], strides = [1, 1, 1]} : vector<2x8x384xf32> to vector<2x8x128xf32>
    %181 = arith.negf %180 : vector<2x8x128xf32>
    %182 = math.exp %181 : vector<2x8x128xf32>
    %cst_54 = arith.constant 1.000000e+00 : f32
    %183 = vector.broadcast %cst_54 : f32 to vector<2x8x128xf32>
    %184 = arith.addf %183, %182 : vector<2x8x128xf32>
    %185 = arith.divf %183, %184 : vector<2x8x128xf32>
    %186 = vector.extract_strided_slice %177 {offsets = [0, 0, 256], sizes = [2, 8, 128], strides = [1, 1, 1]} : vector<2x8x384xf32> to vector<2x8x128xf32>
    %187 = arith.negf %186 : vector<2x8x128xf32>
    %188 = math.exp %187 : vector<2x8x128xf32>
    %cst_55 = arith.constant 1.000000e+00 : f32
    %189 = vector.broadcast %cst_55 : f32 to vector<2x8x128xf32>
    %190 = arith.addf %189, %188 : vector<2x8x128xf32>
    %191 = arith.divf %189, %190 : vector<2x8x128xf32>
    %192 = vector.extract_strided_slice %185 {offsets = [0, 0, 0], sizes = [2, 1, 128], strides = [1, 1, 1]} : vector<2x8x128xf32> to vector<2x1x128xf32>
    %193 = vector.shape_cast %192 : vector<2x1x128xf32> to vector<2x128xf32>
    %194 = arith.mulf %193, %12 : vector<2x128xf32>
    %cst_56 = arith.constant 1.000000e+00 : f32
    %195 = vector.broadcast %cst_56 : f32 to vector<2x128xf32>
    %196 = arith.subf %195, %193 : vector<2x128xf32>
    %197 = vector.extract_strided_slice %179 {offsets = [0, 0, 0], sizes = [2, 1, 128], strides = [1, 1, 1]} : vector<2x8x128xf32> to vector<2x1x128xf32>
    %198 = vector.shape_cast %197 : vector<2x1x128xf32> to vector<2x128xf32>
    %199 = arith.mulf %196, %198 : vector<2x128xf32>
    %200 = arith.addf %194, %199 : vector<2x128xf32>
    %201 = vector.extract_strided_slice %185 {offsets = [0, 1, 0], sizes = [2, 1, 128], strides = [1, 1, 1]} : vector<2x8x128xf32> to vector<2x1x128xf32>
    %202 = vector.shape_cast %201 : vector<2x1x128xf32> to vector<2x128xf32>
    %203 = arith.mulf %202, %200 : vector<2x128xf32>
    %cst_57 = arith.constant 1.000000e+00 : f32
    %204 = vector.broadcast %cst_57 : f32 to vector<2x128xf32>
    %205 = arith.subf %204, %202 : vector<2x128xf32>
    %206 = vector.extract_strided_slice %179 {offsets = [0, 1, 0], sizes = [2, 1, 128], strides = [1, 1, 1]} : vector<2x8x128xf32> to vector<2x1x128xf32>
    %207 = vector.shape_cast %206 : vector<2x1x128xf32> to vector<2x128xf32>
    %208 = arith.mulf %205, %207 : vector<2x128xf32>
    %209 = arith.addf %203, %208 : vector<2x128xf32>
    %210 = vector.extract_strided_slice %185 {offsets = [0, 2, 0], sizes = [2, 1, 128], strides = [1, 1, 1]} : vector<2x8x128xf32> to vector<2x1x128xf32>
    %211 = vector.shape_cast %210 : vector<2x1x128xf32> to vector<2x128xf32>
    %212 = arith.mulf %211, %209 : vector<2x128xf32>
    %cst_58 = arith.constant 1.000000e+00 : f32
    %213 = vector.broadcast %cst_58 : f32 to vector<2x128xf32>
    %214 = arith.subf %213, %211 : vector<2x128xf32>
    %215 = vector.extract_strided_slice %179 {offsets = [0, 2, 0], sizes = [2, 1, 128], strides = [1, 1, 1]} : vector<2x8x128xf32> to vector<2x1x128xf32>
    %216 = vector.shape_cast %215 : vector<2x1x128xf32> to vector<2x128xf32>
    %217 = arith.mulf %214, %216 : vector<2x128xf32>
    %218 = arith.addf %212, %217 : vector<2x128xf32>
    %219 = vector.extract_strided_slice %185 {offsets = [0, 3, 0], sizes = [2, 1, 128], strides = [1, 1, 1]} : vector<2x8x128xf32> to vector<2x1x128xf32>
    %220 = vector.shape_cast %219 : vector<2x1x128xf32> to vector<2x128xf32>
    %221 = arith.mulf %220, %218 : vector<2x128xf32>
    %cst_59 = arith.constant 1.000000e+00 : f32
    %222 = vector.broadcast %cst_59 : f32 to vector<2x128xf32>
    %223 = arith.subf %222, %220 : vector<2x128xf32>
    %224 = vector.extract_strided_slice %179 {offsets = [0, 3, 0], sizes = [2, 1, 128], strides = [1, 1, 1]} : vector<2x8x128xf32> to vector<2x1x128xf32>
    %225 = vector.shape_cast %224 : vector<2x1x128xf32> to vector<2x128xf32>
    %226 = arith.mulf %223, %225 : vector<2x128xf32>
    %227 = arith.addf %221, %226 : vector<2x128xf32>
    %228 = vector.extract_strided_slice %185 {offsets = [0, 4, 0], sizes = [2, 1, 128], strides = [1, 1, 1]} : vector<2x8x128xf32> to vector<2x1x128xf32>
    %229 = vector.shape_cast %228 : vector<2x1x128xf32> to vector<2x128xf32>
    %230 = arith.mulf %229, %227 : vector<2x128xf32>
    %cst_60 = arith.constant 1.000000e+00 : f32
    %231 = vector.broadcast %cst_60 : f32 to vector<2x128xf32>
    %232 = arith.subf %231, %229 : vector<2x128xf32>
    %233 = vector.extract_strided_slice %179 {offsets = [0, 4, 0], sizes = [2, 1, 128], strides = [1, 1, 1]} : vector<2x8x128xf32> to vector<2x1x128xf32>
    %234 = vector.shape_cast %233 : vector<2x1x128xf32> to vector<2x128xf32>
    %235 = arith.mulf %232, %234 : vector<2x128xf32>
    %236 = arith.addf %230, %235 : vector<2x128xf32>
    %237 = vector.extract_strided_slice %185 {offsets = [0, 5, 0], sizes = [2, 1, 128], strides = [1, 1, 1]} : vector<2x8x128xf32> to vector<2x1x128xf32>
    %238 = vector.shape_cast %237 : vector<2x1x128xf32> to vector<2x128xf32>
    %239 = arith.mulf %238, %236 : vector<2x128xf32>
    %cst_61 = arith.constant 1.000000e+00 : f32
    %240 = vector.broadcast %cst_61 : f32 to vector<2x128xf32>
    %241 = arith.subf %240, %238 : vector<2x128xf32>
    %242 = vector.extract_strided_slice %179 {offsets = [0, 5, 0], sizes = [2, 1, 128], strides = [1, 1, 1]} : vector<2x8x128xf32> to vector<2x1x128xf32>
    %243 = vector.shape_cast %242 : vector<2x1x128xf32> to vector<2x128xf32>
    %244 = arith.mulf %241, %243 : vector<2x128xf32>
    %245 = arith.addf %239, %244 : vector<2x128xf32>
    %246 = vector.extract_strided_slice %185 {offsets = [0, 6, 0], sizes = [2, 1, 128], strides = [1, 1, 1]} : vector<2x8x128xf32> to vector<2x1x128xf32>
    %247 = vector.shape_cast %246 : vector<2x1x128xf32> to vector<2x128xf32>
    %248 = arith.mulf %247, %245 : vector<2x128xf32>
    %cst_62 = arith.constant 1.000000e+00 : f32
    %249 = vector.broadcast %cst_62 : f32 to vector<2x128xf32>
    %250 = arith.subf %249, %247 : vector<2x128xf32>
    %251 = vector.extract_strided_slice %179 {offsets = [0, 6, 0], sizes = [2, 1, 128], strides = [1, 1, 1]} : vector<2x8x128xf32> to vector<2x1x128xf32>
    %252 = vector.shape_cast %251 : vector<2x1x128xf32> to vector<2x128xf32>
    %253 = arith.mulf %250, %252 : vector<2x128xf32>
    %254 = arith.addf %248, %253 : vector<2x128xf32>
    %255 = vector.extract_strided_slice %185 {offsets = [0, 7, 0], sizes = [2, 1, 128], strides = [1, 1, 1]} : vector<2x8x128xf32> to vector<2x1x128xf32>
    %256 = vector.shape_cast %255 : vector<2x1x128xf32> to vector<2x128xf32>
    %257 = arith.mulf %256, %254 : vector<2x128xf32>
    %cst_63 = arith.constant 1.000000e+00 : f32
    %258 = vector.broadcast %cst_63 : f32 to vector<2x128xf32>
    %259 = arith.subf %258, %256 : vector<2x128xf32>
    %260 = vector.extract_strided_slice %179 {offsets = [0, 7, 0], sizes = [2, 1, 128], strides = [1, 1, 1]} : vector<2x8x128xf32> to vector<2x1x128xf32>
    %261 = vector.shape_cast %260 : vector<2x1x128xf32> to vector<2x128xf32>
    %262 = arith.mulf %259, %261 : vector<2x128xf32>
    %263 = arith.addf %257, %262 : vector<2x128xf32>
    %264 = vector.shape_cast %200 : vector<2x128xf32> to vector<2x1x128xf32>
    %265 = vector.shape_cast %209 : vector<2x128xf32> to vector<2x1x128xf32>
    %266 = vector.shape_cast %218 : vector<2x128xf32> to vector<2x1x128xf32>
    %267 = vector.shape_cast %227 : vector<2x128xf32> to vector<2x1x128xf32>
    %268 = vector.shape_cast %236 : vector<2x128xf32> to vector<2x1x128xf32>
    %269 = vector.shape_cast %245 : vector<2x128xf32> to vector<2x1x128xf32>
    %270 = vector.shape_cast %254 : vector<2x128xf32> to vector<2x1x128xf32>
    %271 = vector.shape_cast %263 : vector<2x128xf32> to vector<2x1x128xf32>
    %272 = tpu.concatenate %264, %265, %266, %267, %268, %269, %270, %271 in 1 : vector<2x1x128xf32>, vector<2x1x128xf32>, vector<2x1x128xf32>, vector<2x1x128xf32>, vector<2x1x128xf32>, vector<2x1x128xf32>, vector<2x1x128xf32>, vector<2x1x128xf32> -> vector<2x8x128xf32>
    %273 = arith.truncf %9 : vector<2x8x128xf32> to vector<2x8x128xbf16>
    %274 = arith.truncf %272 : vector<2x8x128xf32> to vector<2x8x128xbf16>
    "tpu.trace_start"() <{level = 10 : i32, message = "btd,bsd->bts"}> : () -> ()
    %cst_64 = arith.constant dense<0.000000e+00> : vector<2x8x8xf32>
    %275 = tpu.matmul %274, %273, %cst_64 {dimension_numbers = #tpu.dot_dimension_numbers<[2], [2], [1], [1], [0, 0, 0, 1, 1, 1], [0], [0]>} : vector<2x8x128xbf16>, vector<2x8x128xbf16>, vector<2x8x8xf32> -> vector<2x8x8xf32>
    "tpu.trace_stop"() : () -> ()
    %cst_65 = arith.constant dense<0xFF800000> : vector<2x8xf32>
    %276 = vector.multi_reduction <maximumf>, %275, %cst_65 [2] : vector<2x8x8xf32> to vector<2x8xf32>
    %277 = vector.shape_cast %276 : vector<2x8xf32> to vector<2x8x1xf32>
    %278 = vector.broadcast %277 : vector<2x8x1xf32> to vector<2x8x8xf32>
    %279 = arith.subf %275, %278 : vector<2x8x8xf32>
    %280 = math.exp %279 : vector<2x8x8xf32>
    %cst_66 = arith.constant dense<0.000000e+00> : vector<2x8xf32>
    %281 = vector.multi_reduction <add>, %280, %cst_66 [2] : vector<2x8x8xf32> to vector<2x8xf32>
    %282 = vector.shape_cast %281 : vector<2x8xf32> to vector<2x8x1xf32>
    %283 = tpu.reciprocal %282 {approx = true} : vector<2x8x1xf32> -> vector<2x8x1xf32>
    %284 = vector.broadcast %283 : vector<2x8x1xf32> to vector<2x8x8xf32>
    %285 = arith.mulf %280, %284 : vector<2x8x8xf32>
    %286 = arith.truncf %285 : vector<2x8x8xf32> to vector<2x8x8xbf16>
    "tpu.trace_start"() <{level = 10 : i32, message = "bts,bsd->btd"}> : () -> ()
    %cst_67 = arith.constant dense<0.000000e+00> : vector<2x8x128xf32>
    %287 = tpu.matmul %286, %273, %cst_67 {dimension_numbers = #tpu.dot_dimension_numbers<[2], [1], [1], [2], [0, 0, 0, 1, 1, 2], [0], [0]>} : vector<2x8x8xbf16>, vector<2x8x128xbf16>, vector<2x8x128xf32> -> vector<2x8x128xf32>
    "tpu.trace_stop"() : () -> ()
    %288 = tpu.concatenate %287, %272 in 2 : vector<2x8x128xf32>, vector<2x8x128xf32> -> vector<2x8x256xf32>
    %289 = vector.shape_cast %288 : vector<2x8x256xf32> to vector<16x256xf32>
    %290 = arith.truncf %289 : vector<16x256xf32> to vector<16x256xbf16>
    %c0_68 = arith.constant 0 : index
    %c0_69 = arith.constant 0 : index
    %291 = vector.load %arg8[%c0_68, %c0_69] : memref<256x128xbf16, #tpu.memory_space<vmem>>, vector<256x128xbf16>
    %cst_70 = arith.constant dense<0.000000e+00> : vector<16x128xf32>
    %292 = tpu.matmul %290, %291, %cst_70 {dimension_numbers = #tpu.dot_dimension_numbers<[1], [0], [0], [1], [0, 0, 1, 1], [], []>} : vector<16x256xbf16>, vector<256x128xbf16>, vector<16x128xf32> -> vector<16x128xf32>
    %c0_71 = arith.constant 0 : index
    %c0_72 = arith.constant 0 : index
    %293 = vector.load %arg9[%c0_71, %c0_72] : memref<1x128xf32, #tpu.memory_space<vmem>>, vector<1x128xf32>
    %294 = vector.broadcast %293 : vector<1x128xf32> to vector<16x128xf32>
    %295 = arith.addf %292, %294 : vector<16x128xf32>
    %296 = vector.shape_cast %295 : vector<16x128xf32> to vector<2x8x128xf32>
    %297 = arith.mulf %191, %296 : vector<2x8x128xf32>
    %c1 = arith.constant 1 : index
    %c0_73 = arith.constant 0 : index
    %c0_74 = arith.constant 0 : index
    %c0_75 = arith.constant 0 : index
    %298 = vector.load %arg10[%c1, %c0_73, %c0_74, %c0_75] : memref<2x2x8x128xf32, #tpu.memory_space<vmem>>, vector<1x2x8x128xf32>
    %299 = vector.shape_cast %298 : vector<1x2x8x128xf32> to vector<2x8x128xf32>
    %300 = vector.shape_cast %272 : vector<2x8x128xf32> to vector<1x2x8x128xf32>
    tpu.vector_store %arg10[%c1, %c0_73, %c0_74, %c0_75], %300 {strides = array<i32>} : memref<2x2x8x128xf32, #tpu.memory_space<vmem>>, vector<1x2x8x128xf32>,
    %c1_76 = arith.constant 1 : index
    %c0_77 = arith.constant 0 : index
    %c0_78 = arith.constant 0 : index
    %c0_79 = arith.constant 0 : index
    %301 = vector.load %arg11[%c1_76, %c0_77, %c0_78, %c0_79] : memref<2x2x8x128xf32, #tpu.memory_space<vmem>>, vector<1x2x8x128xf32>
    %302 = vector.shape_cast %301 : vector<1x2x8x128xf32> to vector<2x8x128xf32>
    %303 = vector.shape_cast %297 : vector<2x8x128xf32> to vector<1x2x8x128xf32>
    tpu.vector_store %arg11[%c1_76, %c0_77, %c0_78, %c0_79], %303 {strides = array<i32>} : memref<2x2x8x128xf32, #tpu.memory_space<vmem>>, vector<1x2x8x128xf32>,
    return
  }
}

</mosaic_0001>

<bundles_post_ra>
// kernel: seq2seq_forward.1
= control target key start
LH: loop header
LB: loop body
LE: loop exit
PB: predicated region body
PF: predicated region fallthrough
CT: control target
= control target key end

     0   :  { %17 = vsyncpa [#allocation3], 0  ;;  %s2789_s0 = inlined_call_operand.vmem [shape: f32[2,8,128], index: 0, kind: input, shape index: {}]   ;;  %s2790_s1 = inlined_call_operand.hbm [shape: bf16[128,128], index: 1, kind: input, shape index: {}]   ;;  %s2791_s2 = inlined_call_operand.vmem [shape: f32[1,128], index: 2, kind: input, shape index: {}]   ;;  %s2792_s3 = inlined_call_operand.vmem [shape: f32[2,8,128], index: 3, kind: input, shape index: {}]   ;;  %s2793_s4 = inlined_call_operand.vmem [shape: bf16[256,384], index: 4, kind: input, shape index: {}]   ;;  %s2794_s5 = inlined_call_operand.vmem [shape: f32[1,384], index: 5, kind: input, shape index: {}]   ;;  %s2795_s6 = inlined_call_operand.hbm [shape: bf16[256,384], index: 6, kind: input, shape index: {}]   ;;  %s2796_s7 = inlined_call_operand.vmem [shape: f32[1,384], index: 7, kind: input, shape index: {}]   ;;  %s2797_s8 = inlined_call_operand.hbm [shape: bf16[256,128], index: 8, kind: input, shape index: {}]   ;;  %s2798_s9 = inlined_call_operand.vmem [shape: f32[1,128], index: 9, kind: input, shape index: {}]   ;;  %s2799_s10 = inlined_call_operand.vmem [shape: f32[2,2,8,128], index: 10, kind: output, shape index: {0}]   ;;  %s2800_s11 = inlined_call_operand.vmem [shape: f32[2,2,8,128], index: 11, kind: output, shape index: {1}]  }
   0x1   :  { %18 = vsyncpa [#allocation5], 0  ;;  %s2305_s17 = smov [#allocation4]   ;;  %s2235_s21 = scalar_lea.hbm %s2795_s6, 6144 }
   0x2   :  { %s46_s18 = sshll.u32 %s2305_s17, 4  ;;  %p2236_p0 = scmp.ne.s32.totalorder %s2795_s6, %s2235_s21  ;;  %s47_s18 = int_to_ptr.vmem [resolvable:$true] %s46_s18 }
   0x3   :  { %p2239_p1 = scmp.lt.u32.totalorder %s2235_s21, %s2795_s6 }
   0x5   :  { %p2241_p2 = pnand %p2239_p1, %p2236_p0 }
   0x7   :  { %2244 = shalt.err (!%p2241_p2)
}
   0x8   :  { %s2245_s26 = scalar_lea.vmem %s47_s18, 6144  ;;  %p2250_p4 = scmp.lt.s32.totalorder %s47_s18, %s47_s18 }
   0x9   :  { %p2246_p3 = scmp.ne.s32.totalorder %s47_s18, %s2245_s26  ;;  %p2251_p5 = scmp.lt.s32.totalorder %s2245_s26, %s2245_s26 }
   0xb   :  { %p2252_p6 = por %p2251_p5, %p2250_p4 }
   0xd   :  { %p2253_p7 = pnand %p2252_p6, %p2246_p3 }
   0xf   :  { %2256 = shalt.err (!%p2253_p7)
}
  0x10   :  { %s2306_s27 = smov 192   ;;  %s2307_s28 = smov 12  }
  0x11   :  { %52 = dma.hbm_to_vmem [thread:$0]  %s2795_s6, 6144, %s47_s18, [#allocation5], %s2306_s27, %s2306_s27, %s2307_s28  }
  0x12   :  { %s2308_s12 = smov [#allocation2]   ;;  %s2257_s16 = scalar_lea.hbm %s2790_s1, 1024 }
  0x13   :  { %s26_s13 = sshll.u32 %s2308_s12, 4  ;;  %p2258_p8 = scmp.ne.s32.totalorder %s2790_s1, %s2257_s16  ;;  %s27_s13 = int_to_ptr.vmem [resolvable:$true] %s26_s13 }
  0x14   :  { %p2261_p9 = scmp.lt.u32.totalorder %s2257_s16, %s2790_s1 }
  0x16   :  { %p2263_p10 = pnand %p2261_p9, %p2258_p8 }
  0x18   :  { %2266 = shalt.err (!%p2263_p10)
}
  0x19   :  { %s2267_s22 = scalar_lea.vmem %s27_s13, 1024  ;;  %p2272_p12 = scmp.lt.s32.totalorder %s27_s13, %s27_s13 }
  0x1a   :  { %p2268_p11 = scmp.ne.s32.totalorder %s27_s13, %s2267_s22  ;;  %p2273_p13 = scmp.lt.s32.totalorder %s2267_s22, %s2267_s22 }
  0x1c   :  { %p2274_p0 = por %p2273_p13, %p2272_p12 }
  0x1e   :  { %p2275_p1 = pnand %p2274_p0, %p2268_p11 }
  0x20   :  { %2278 = shalt.err (!%p2275_p1)
}
  0x21   :  { %s2309_s6 = smov 64   ;;  %s2310_s18 = smov 4  }
  0x22   :  { %32 = dma.hbm_to_vmem [thread:$0]  %s2790_s1, 1024, %s27_s13, [#allocation3], %s2309_s6, %s2309_s6, %s2310_s18  }
  0x23   :  { %s2311_s25 = smov [#allocation6]   ;;  %s2279_s29 = scalar_lea.hbm %s2797_s8, 2048 }
  0x24   :  { %s60_s26 = sshll.u32 %s2311_s25, 4  ;;  %p2280_p2 = scmp.ne.s32.totalorder %s2797_s8, %s2279_s29  ;;  %s61_s26 = int_to_ptr.vmem [resolvable:$true] %s60_s26 }
  0x25   :  { %p2283_p3 = scmp.lt.u32.totalorder %s2279_s29, %s2797_s8 }
  0x27   :  { %p2285_p4 = pnand %p2283_p3, %p2280_p2 }
  0x29   :  { %2288 = shalt.err (!%p2285_p4)
}
  0x2a   :  { %s2289_s16 = scalar_lea.vmem %s61_s26, 2048  ;;  %p2294_p6 = scmp.lt.s32.totalorder %s61_s26, %s61_s26 }
  0x2b   :  { %p2290_p5 = scmp.ne.s32.totalorder %s61_s26, %s2289_s16  ;;  %p2295_p7 = scmp.lt.s32.totalorder %s2289_s16, %s2289_s16 }
  0x2d   :  { %p2296_p8 = por %p2295_p7, %p2294_p6 }
  0x2f   :  { %p2297_p9 = pnand %p2296_p8, %p2290_p5 }
  0x31   :  { %2300 = shalt.err (!%p2297_p9)
}
  0x32   :  { %66 = dma.hbm_to_vmem [thread:$0]  %s2797_s8, 2048, %s61_s26, [#allocation5], %s2309_s6, %s2309_s6, %s2310_s18  }
  0x33   :  { %2301 = dma.done.wait [#allocation3], 1024  }
  0x34   :  { %2302 = vsyncadd [#allocation3], 4294966272 }
  0x35   :  { %2303 = dma.done.wait [#allocation5], 8192  }
  0x36   :  { %2304 = vsyncadd [#allocation5], 4294959104  ;;  %v2312_v0 = vmov 0.0   ;;  %vm2313_vm0 = vmmov 0   ;;  %v2031_v1 = vld [vmem:[%s2793_s4 + $0x4] ss:$12 sps:$4 sm:$0xff]   ;;  %v213_v24 = vlaneseq }
  0x37   :  { %1978 = vmatprep.subr.bf16.mxu0 %v2312_v0  ;;  %1994 = vmatprep.mubr.msk.bf16.mxu0 %vm2313_vm0, %v2312_v0  ;;  %v2033_v2 = vld [vmem:[%s2793_s4] ss:$12 sps:$4 sm:$0xff]   ;;  %v2034_v3 = vld [vmem:[%s2793_s4 + $0x1c] ss:$12 sps:$4 sm:$0xff]   ;;  %v2036_v4 = vld [vmem:[%s2793_s4 + $0x18] ss:$12 sps:$4 sm:$0xff]  }
  0x38   :  { %588 = vmatprep.subr.bf16.mxu1 %v2031_v1  ;;  %v2037_v5 = vld [vmem:[%s2793_s4 + $0x34] ss:$12 sps:$4 sm:$0xff]   ;;  %v2039_v6 = vld [vmem:[%s2793_s4 + $0x30] ss:$12 sps:$4 sm:$0xff]   ;;  %v2040_v7 = vld [vmem:[%s2793_s4 + $0x4c] ss:$12 sps:$4 sm:$0xff]  }
  0x39   :  { %589 = vmatpush1.bf16.msra.mxu1 %v2033_v2  ;;  %v2042_v8 = vld [vmem:[%s2793_s4 + $0x48] ss:$12 sps:$4 sm:$0xff]   ;;  %v2054_v9 = vld [vmem:[#allocation2] sm:$0xff]   ;;  %v2066_v17 = vld [vmem:[#allocation2 + $0x18] sm:$0xff]   ;;  %v2490_v32 = vshrl.u32 %v213_v24, 7  ;;  %vm776_vm5 = vcmask 1040384  }
  0x3a   :  { %590 = vmatprep.subr.bf16.mxu1 %v2034_v3  ;;  %v2043_v10 = vld [vmem:[%s2793_s4 + $0x64] ss:$12 sps:$4 sm:$0xff]   ;;  %1979 = vmatpush3.bf16.msra.mxu0 %v2054_v9  ;;  %v2058_v11 = vld [vmem:[#allocation2 + $0x8] sm:$0xff]   ;;  %v2049_v16 = vld [vmem:[%s2793_s4 + $0x94] ss:$12 sps:$4 sm:$0xff]   ;;  %vm779_vm6 = vcmask 1041408  }
  0x3b   :  { %1980 = vmatprep.subr.bf16.mxu0 %v2312_v0  ;;  %v2045_v12 = vld [vmem:[%s2793_s4 + $0x60] ss:$12 sps:$4 sm:$0xff]   ;;  %v2046_v13 = vld [vmem:[%s2793_s4 + $0x7c] ss:$12 sps:$4 sm:$0xff]   ;;  %v2062_v14 = vld [vmem:[#allocation2 + $0x10] sm:$0xff]   ;;  %v215_v37 = vadd.s32 8, %v2490_v32 }
  0x3c   :  { %v2048_v15 = vld [vmem:[%s2793_s4 + $0x78] ss:$12 sps:$4 sm:$0xff]   ;;  %v2051_v18 = vld [vmem:[%s2793_s4 + $0x90] ss:$12 sps:$4 sm:$0xff]   ;;  %v2055_v21 = vld [vmem:[%s2793_s4 + $0xa8] ss:$12 sps:$4 sm:$0xff]  }
  0x3d   :  { %591 = vmatpush1.bf16.msra.mxu1 %v2036_v4  ;;  %v2052_v19 = vld [vmem:[%s2793_s4 + $0xac] ss:$12 sps:$4 sm:$0xff]   ;;  %v2070_v20 = vld [vmem:[#allocation2 + $0x20] sm:$0xff]   ;;  %v2060_v29 = vld [vmem:[%s2793_s4 + $0xdc] ss:$12 sps:$4 sm:$0xff]   ;;  %v220_v50 = vand.u32 7, %v2490_v32 }
  0x3e   :  { %592 = vmatprep.subr.bf16.mxu1 %v2037_v5  ;;  %1981 = vmatpush3.bf16.msra.mxu0 %v2058_v11  ;;  %v2056_v22 = vld [vmem:[%s2793_s4 + $0xc4] ss:$12 sps:$4 sm:$0xff]   ;;  %v2074_v23 = vld [vmem:[#allocation2 + $0x28] sm:$0xff]   ;;  %v2064_v33 = vld [vmem:[%s2793_s4 + $0xf4] ss:$12 sps:$4 sm:$0xff]   ;;  %v227_v52 = vand.u32 7, %v215_v37 }
  0x3f   :  { %1982 = vmatprep.subr.bf16.mxu0 %v2312_v0  ;;  %v2472_v25 = vld [vmem:[%s2792_s3] sm:$0xff]  ;;  %v2477_v26 = vld [vmem:[%s2792_s3 + $0x8] sm:$0xff]  ;;  %v2078_v31 = vld [vmem:[#allocation2 + $0x30] sm:$0xff]   ;;  %vm245_vm1 = vcmp.ge.s32.totalorder %v220_v50, 1  ;;  %vm242_vm4 = vcmp.lt.s32.totalorder %v2490_v32, 1  ;;  %vm782_vm7 = vcmask 1042432  }
  0x40   :  { %v2059_v27 = vld [vmem:[%s2793_s4 + $0xc0] ss:$12 sps:$4 sm:$0xff]   ;;  %v250_v28 = vpack.c.bf16 %v2477_v26, %v2472_v25  ;;  %v2063_v30 = vld [vmem:[%s2793_s4 + $0xd8] ss:$12 sps:$4 sm:$0xff]   ;;  %v2087_v38 = vld [vmem:[%s2793_s4 + $0xc8] ss:$12 sps:$4 sm:$0xff]  }
  0x41   :  { %593 = vmatpush1.bf16.msra.mxu1 %v2039_v6  ;;  %v2082_v34 = vld [vmem:[#allocation2 + $0x38] sm:$0xff]   ;;  %v79_v35 = vld [vmem:[%s2789_s0] sm:$0xff]  ;;  %v80_v36 = vld [vmem:[%s2789_s0 + $0x8] sm:$0xff]  ;;  %vm246_vm2 = vcmp.ge.s32.totalorder %v227_v52, 1  ;;  %v240_v60 = vrot.slane %v2472_v25, 7  ;;  %v241_v61 = vrot.slane %v2477_v26, 7 }
  0x42   :  { %594 = vmatprep.subr.bf16.mxu1 %v2040_v7  ;;  %1983 = vmatpush3.bf16.msra.mxu0 %v2062_v14  ;;  %v2067_v39 = vld [vmem:[%s2793_s4 + $0xf0] ss:$12 sps:$4 sm:$0xff]   ;;  %v2068_v40 = vld [vmem:[%s2793_s4 + $0x10c] ss:$12 sps:$4 sm:$0xff]   ;;  %v81_v41 = vpack.c.bf16 %v80_v36, %v79_v35  ;;  %v2088_v42 = vld [vmem:[%s2793_s4 + $0x8] ss:$12 sps:$4 sm:$0xff]  }
  0x43   :  { %1984 = vmatprep.subr.bf16.mxu0 %v2312_v0  ;;  %620 = vmatprep.mubr.bf16.mxu1 %v250_v28  ;;  %v2089_v43 = vld [vmem:[%s2793_s4 + $0xe0] ss:$12 sps:$4 sm:$0xff]   ;;  %v2071_v44 = vld [vmem:[%s2793_s4 + $0x108] ss:$12 sps:$4 sm:$0xff]   ;;  %v2072_v45 = vld [vmem:[%s2793_s4 + $0x124] ss:$12 sps:$4 sm:$0xff]   ;;  %v243_v3 = vsel %vm242_vm4, %v240_v60, %v241_v61  ;;  %v244_v4 = vsel %vm242_vm4, %v241_v61, %v240_v60 }
  0x44   :  { %v2075_v46 = vld [vmem:[%s2793_s4 + $0x120] ss:$12 sps:$4 sm:$0xff]   ;;  %v2091_v48 = vld [vmem:[%s2793_s4 + $0xf8] ss:$12 sps:$4 sm:$0xff]   ;;  %v2076_v49 = vld [vmem:[%s2793_s4 + $0x13c] ss:$12 sps:$4 sm:$0xff]   ;;  %v1805_v7 = vpack.c.bf16 %v243_v3, %v244_v4 }
  0x45   :  { %595 = vmatpush1.bf16.msra.mxu1 %v2042_v8  ;;  %v2090_v47 = vld [vmem:[%s2793_s4 + $0x20] ss:$12 sps:$4 sm:$0xff]   ;;  %v2092_v51 = vld [vmem:[%s2793_s4 + $0x38] ss:$12 sps:$4 sm:$0xff]   ;;  %v2093_v53 = vld [vmem:[%s2793_s4 + $0x110] ss:$12 sps:$4 sm:$0xff]  }
  0x46   :  { %596 = vmatprep.subr.bf16.mxu1 %v2043_v10  ;;  %1985 = vmatpush3.bf16.msra.mxu0 %v2066_v17  ;;  %v2079_v54 = vld [vmem:[%s2793_s4 + $0x138] ss:$12 sps:$4 sm:$0xff]   ;;  %v2080_v55 = vld [vmem:[%s2793_s4 + $0x154] ss:$12 sps:$4 sm:$0xff]   ;;  %v2094_v56 = vld [vmem:[%s2793_s4 + $0x50] ss:$12 sps:$4 sm:$0xff]  }
  0x47   :  { %1986 = vmatprep.subr.bf16.mxu0 %v2312_v0  ;;  %v2095_v57 = vld [vmem:[%s2793_s4 + $0x128] ss:$12 sps:$4 sm:$0xff]   ;;  %v2083_v58 = vld [vmem:[%s2793_s4 + $0x150] ss:$12 sps:$4 sm:$0xff]   ;;  %v2084_v59 = vld [vmem:[%s2793_s4 + $0x16c] ss:$12 sps:$4 sm:$0xff]  }
  0x48   :  { %vm2564_vm3 = vmpackc.low %vm246_vm2, %vm245_vm1  ;;  %v2096_v63 = vld [vmem:[%s2793_s4 + $0x68] ss:$12 sps:$4 sm:$0xff]   ;;  %v2097_v1 = vld [vmem:[%s2793_s4 + $0x140] ss:$12 sps:$4 sm:$0xff]   ;;  %vm785_vm8 = vcmask 1043456   ;;  %vm788_vm9 = vcmask 1044480  }
  0x49   :  { %597 = vmatpush1.bf16.msra.mxu1 %v2045_v12  ;;  %v2086_v2 = vld [vmem:[%s2793_s4 + $0x168] ss:$12 sps:$4 sm:$0xff]   ;;  %v2098_v5 = vld [vmem:[%s2793_s4 + $0x80] ss:$12 sps:$4 sm:$0xff]   ;;  %v2099_v6 = vld [vmem:[%s2793_s4 + $0x158] ss:$12 sps:$4 sm:$0xff]  }
  0x4a   :  { %598 = vmatprep.subr.bf16.mxu1 %v2046_v13  ;;  %1987 = vmatpush3.bf16.msra.mxu0 %v2070_v20  ;;  %v2100_v8 = vld [vmem:[%s2793_s4 + $0x98] ss:$12 sps:$4 sm:$0xff]   ;;  %v2101_v9 = vld [vmem:[%s2793_s4 + $0x170] ss:$12 sps:$4 sm:$0xff]   ;;  %v2103_v11 = vld [vmem:[#allocation4] ss:$12 sps:$4 sm:$0xff]  }
  0x4b   :  { %1988 = vmatprep.subr.bf16.mxu0 %v2312_v0  ;;  %v2102_v10 = vld [vmem:[%s2793_s4 + $0xb0] ss:$12 sps:$4 sm:$0xff]   ;;  %v2106_v14 = vld [vmem:[#allocation4 + $0x18] ss:$12 sps:$4 sm:$0xff]   ;;  %v2124_v20 = vld [vmem:[#allocation4 + $0xc8] ss:$12 sps:$4 sm:$0xff]  }
  0x4c   :  { %v2105_v12 = vld [vmem:[#allocation4 + $0x4] ss:$12 sps:$4 sm:$0xff]   ;;  %v2108_v13 = vld [vmem:[#allocation4 + $0x1c] ss:$12 sps:$4 sm:$0xff]   ;;  %v2114_v17 = vld [vmem:[#allocation4 + $0x4c] ss:$12 sps:$4 sm:$0xff]  }
  0x4d   :  { %599 = vmatpush1.bf16.msra.mxu1 %v2048_v15  ;;  %v2111_v15 = vld [vmem:[#allocation4 + $0x34] ss:$12 sps:$4 sm:$0xff]   ;;  %v2120_v25 = vld [vmem:[#allocation4 + $0x7c] ss:$12 sps:$4 sm:$0xff]   ;;  %v2134_v26 = vld [vmem:[#allocation4 + $0xf8] ss:$12 sps:$4 sm:$0xff]  }
  0x4e   :  { %600 = vmatprep.subr.bf16.mxu1 %v2049_v16  ;;  %1989 = vmatpush3.bf16.msra.mxu0 %v2074_v23  ;;  %v2109_v16 = vld [vmem:[#allocation4 + $0x30] ss:$12 sps:$4 sm:$0xff]   ;;  %v2115_v23 = vld [vmem:[#allocation4 + $0x60] ss:$12 sps:$4 sm:$0xff]   ;;  %v2144_v35 = vld [vmem:[#allocation4 + $0x128] ss:$12 sps:$4 sm:$0xff]  }
  0x4f   :  { %1990 = vmatprep.subr.bf16.mxu0 %v2312_v0  ;;  %v2130_v24 = vld [vmem:[#allocation4 + $0x20] ss:$12 sps:$4 sm:$0xff]   ;;  %v2126_v36 = vld [vmem:[#allocation4 + $0xa8] ss:$12 sps:$4 sm:$0xff]   ;;  %v2153_v52 = vld [vmem:[#allocation4 + $0x124] ss:$12 sps:$4 sm:$0xff]  }
  0x50   :  { %v2145_v37 = vld [vmem:[#allocation4 + $0x68] ss:$12 sps:$4 sm:$0xff]   ;;  %v2148_v50 = vld [vmem:[#allocation4 + $0x10c] ss:$12 sps:$4 sm:$0xff]   ;;  %vm791_vm10 = vcmask 1045504   ;;  %vm794_vm11 = vcmask 1046528  }
  0x51   :  { %601 = vmatpush1.bf16.msra.mxu1 %v2051_v18  ;;  %v2112_v18 = vld [vmem:[#allocation4 + $0x48] ss:$12 sps:$4 sm:$0xff]   ;;  %vm1434_vm12 = vcmask 64512  }
  0x52   :  { %602 = vmatprep.subr.bf16.mxu1 %v2052_v19  ;;  %1991 = vmatpush3.bf16.msra.mxu0 %v2078_v31  ;;  %v2117_v19 = vld [vmem:[#allocation4 + $0x64] ss:$12 sps:$4 sm:$0xff]  }
  0x53   :  { %1992 = vmatprep.subr.bf16.mxu0 %v2312_v0  ;;  %v2121_v31 = vld [vmem:[#allocation4 + $0x90] ss:$12 sps:$4 sm:$0xff]  }
  0x55   :  { %603 = vmatpush1.bf16.msra.mxu1 %v2055_v21  ;;  %v2125_v21 = vld [vmem:[#allocation4 + $0x8] ss:$12 sps:$4 sm:$0xff]  }
  0x56   :  { %604 = vmatprep.subr.bf16.mxu1 %v2056_v22  ;;  %1993 = vmatpush3.bf16.msra.mxu0 %v2082_v34  ;;  %v2129_v22 = vld [vmem:[#allocation4 + $0xe0] ss:$12 sps:$4 sm:$0xff]  }
  0x57   :  { %1904 = vmatprep.subr.bf16.mxu0 %v2087_v38  ;;  %v2128_v34 = vld [vmem:[#allocation4 + $0xac] ss:$12 sps:$4 sm:$0xff]   ;;  %v2133_v38 = vld [vmem:[#allocation4 + $0xc4] ss:$12 sps:$4 sm:$0xff]  }
  0x59   :  { %605 = vmatpush1.bf16.msra.mxu1 %v2059_v27  ;;  %1995 = vmatmul.mubr.bf16.vlgmr.msra.gmra.mrb[0].mxu0 %v81_v41  ;;  %v2118_v27 = vld [vmem:[#allocation4 + $0x78] ss:$12 sps:$4 sm:$0xff]   ;;  %v2150_v41 = vld [vmem:[#allocation4 + $0x80] ss:$12 sps:$4 sm:$0xff]  }
  0x5a   :  { %606 = vmatprep.subr.bf16.mxu1 %v2060_v29  ;;  %1905 = vmatpush3.bf16.msra.mxu0 %v2088_v42  ;;  %v2123_v29 = vld [vmem:[#allocation4 + $0x94] ss:$12 sps:$4 sm:$0xff]   ;;  %v2138_v42 = vld [vmem:[#allocation4 + $0xdc] ss:$12 sps:$4 sm:$0xff]  }
  0x5b   :  { %663 = vmatprep.mubr.bf16.mxu0 %v250_v28  ;;  %1906 = vmatprep.subr.bf16.mxu0 %v2089_v43  ;;  %v2135_v28 = vld [vmem:[#allocation4 + $0x38] ss:$12 sps:$4 sm:$0xff]  }
  0x5c   :  { %v2154_v43 = vld [vmem:[#allocation4 + $0x158] ss:$12 sps:$4 sm:$0xff]  }
  0x5d   :  { %607 = vmatpush1.bf16.msra.mxu1 %v2063_v30  ;;  %v2139_v30 = vld [vmem:[#allocation4 + $0x110] ss:$12 sps:$4 sm:$0xff]  }
  0x5e   :  { %608 = vmatprep.subr.bf16.mxu1 %v2064_v33  ;;  %1907 = vmatpush3.bf16.msra.mxu0 %v2090_v47  ;;  %v2140_v33 = vld [vmem:[#allocation4 + $0x50] ss:$12 sps:$4 sm:$0xff]  }
  0x5f   :  { %1908 = vmatprep.subr.bf16.mxu0 %v2091_v48  ;;  %v2159_v47 = vld [vmem:[#allocation4 + $0x170] ss:$12 sps:$4 sm:$0xff]  }
  0x60   :  { %v2141_v48 = vld [vmem:[#allocation4 + $0xf0] ss:$12 sps:$4 sm:$0xff]  }
  0x61   :  { %609 = vmatpush1.bf16.msra.mxu1 %v2067_v39  ;;  %v2149_v39 = vld [vmem:[#allocation4 + $0x140] ss:$12 sps:$4 sm:$0xff]  }
  0x62   :  { %610 = vmatprep.subr.bf16.mxu1 %v2068_v40  ;;  %1909 = vmatpush3.bf16.msra.mxu0 %v2092_v51  ;;  %v2131_v40 = vld [vmem:[#allocation4 + $0xc0] ss:$12 sps:$4 sm:$0xff]   ;;  %v2146_v51 = vld [vmem:[#allocation4 + $0x108] ss:$12 sps:$4 sm:$0xff]  }
  0x63   :  { %1910 = vmatprep.subr.bf16.mxu0 %v2093_v53  ;;  %v2151_v53 = vld [vmem:[#allocation4 + $0x120] ss:$12 sps:$4 sm:$0xff]  }
  0x65   :  { %611 = vmatpush1.bf16.msra.mxu1 %v2071_v44  ;;  %v2136_v44 = vld [vmem:[#allocation4 + $0xd8] ss:$12 sps:$4 sm:$0xff]  }
  0x66   :  { %612 = vmatprep.subr.bf16.mxu1 %v2072_v45  ;;  %1911 = vmatpush3.bf16.msra.mxu0 %v2094_v56  ;;  %v2155_v45 = vld [vmem:[#allocation4 + $0x98] ss:$12 sps:$4 sm:$0xff]   ;;  %v2163_v56 = vld [vmem:[#allocation4 + $0x154] ss:$12 sps:$4 sm:$0xff]  }
  0x67   :  { %1912 = vmatprep.subr.bf16.mxu0 %v2095_v57  ;;  %v2161_v57 = vld [vmem:[#allocation4 + $0x150] ss:$12 sps:$4 sm:$0xff]  }
  0x69   :  { %613 = vmatpush1.bf16.msra.mxu1 %v2075_v46  ;;  %v2143_v46 = vld [vmem:[#allocation4 + $0xf4] ss:$12 sps:$4 sm:$0xff]  }
  0x6a   :  { %614 = vmatprep.subr.bf16.mxu1 %v2076_v49  ;;  %1913 = vmatpush3.bf16.msra.mxu0 %v2096_v63  ;;  %v2160_v49 = vld [vmem:[#allocation4 + $0xb0] ss:$12 sps:$4 sm:$0xff]  }
  0x6b   :  { %1914 = vmatprep.subr.bf16.mxu0 %v2097_v1 }
  0x6d   :  { %615 = vmatpush1.bf16.msra.mxu1 %v2079_v54  ;;  %v2158_v54 = vld [vmem:[#allocation4 + $0x13c] ss:$12 sps:$4 sm:$0xff]  }
  0x6e   :  { %616 = vmatprep.subr.bf16.mxu1 %v2080_v55  ;;  %1915 = vmatpush3.bf16.msra.mxu0 %v2098_v5  ;;  %v2156_v55 = vld [vmem:[#allocation4 + $0x138] ss:$12 sps:$4 sm:$0xff]   ;;  %v323_v5 = vsub.s32 1, %v2490_v32 }
  0x6f   :  { %1916 = vmatprep.subr.bf16.mxu0 %v2099_v6  ;;  %v315_v6 = vld [vmem:[%s2794_s5] sm:$0x7] }
  0x71   :  { %617 = vmatpush1.bf16.msra.mxu1 %v2083_v58  ;;  %v2166_v58 = vld [vmem:[#allocation4 + $0x16c] ss:$12 sps:$4 sm:$0xff]  }
  0x72   :  { %618 = vmatprep.subr.bf16.mxu1 %v2084_v59  ;;  %1917 = vmatpush3.bf16.msra.mxu0 %v2100_v8  ;;  %v2164_v59 = vld [vmem:[#allocation4 + $0x168] ss:$12 sps:$4 sm:$0xff]  }
  0x73   :  { %1918 = vmatprep.subr.bf16.mxu0 %v2101_v9 }
  0x75   :  { %619 = vmatpush1.bf16.msra.mxu1 %v2086_v2  ;;  %v1747_v2 = vld [vmem:[%s2791_s2] ss:$0 sm:$0xff] }
  0x76   :  { %1919 = vmatpush3.bf16.msra.mxu0 %v2102_v10  ;;  %1926 = vmatprep.subr.bf16.mxu1 %v2124_v20  ;;  %v319_v20 = vsub.s32 0, %v2490_v32 }
  0x77   :  { %1148 = vmatprep.subr.bf16.mxu0 %v2105_v12 }
  0x78   :  { %1806 = vmatmul.mubr.msk.bf16.vlgmr.msra.gmra.mrb[0].mxu1 %vm2564_vm3, %v1805_v7 }
  0x79   :  { %1809 = vmatmul.mubr.msk.bf16.vlgmr.msra.gmra.mrb[4].mxu0 %vm2564_vm3, %v1805_v7  ;;  %1927 = vmatpush3.bf16.msra.mxu1 %v2125_v21  ;;  %v324_v7 = vrot.slane %v315_v6, %v323_v5 }
  0x7a   :  { %1149 = vmatpush1.bf16.msra.mxu0 %v2103_v11  ;;  %1928 = vmatprep.subr.bf16.mxu1 %v2129_v22 }
  0x7b   :  { %1150 = vmatprep.subr.bf16.mxu0 %v2108_v13 }
  0x7d   :  { %1929 = vmatpush3.bf16.msra.mxu1 %v2130_v24 }
  0x7e   :  { %1151 = vmatpush1.bf16.msra.mxu0 %v2106_v14  ;;  %1930 = vmatprep.subr.bf16.mxu1 %v2134_v26 }
  0x7f   :  { %1152 = vmatprep.subr.bf16.mxu0 %v2111_v15 }
  0x81   :  { %1931 = vmatpush3.bf16.msra.mxu1 %v2135_v28 }
  0x82   :  { %1153 = vmatpush1.bf16.msra.mxu0 %v2109_v16  ;;  %1932 = vmatprep.subr.bf16.mxu1 %v2139_v30 }
  0x83   :  { %1154 = vmatprep.subr.bf16.mxu0 %v2114_v17 }
  0x85   :  { %1933 = vmatpush3.bf16.msra.mxu1 %v2140_v33 }
  0x86   :  { %1155 = vmatpush1.bf16.msra.mxu0 %v2112_v18  ;;  %1934 = vmatprep.subr.bf16.mxu1 %v2144_v35 }
  0x87   :  { %1156 = vmatprep.subr.bf16.mxu0 %v2117_v19 }
  0x89   :  { %1935 = vmatpush3.bf16.msra.mxu1 %v2145_v37 }
  0x8a   :  { %1157 = vmatpush1.bf16.msra.mxu0 %v2115_v23  ;;  %1936 = vmatprep.subr.bf16.mxu1 %v2149_v39 }
  0x8b   :  { %1158 = vmatprep.subr.bf16.mxu0 %v2120_v25  ;;  %v320_v25 = vrot.slane %v315_v6, %v319_v20 }
  0x8d   :  { %1937 = vmatpush3.bf16.msra.mxu1 %v2150_v41 }
  0x8e   :  { %1159 = vmatpush1.bf16.msra.mxu0 %v2118_v27  ;;  %1938 = vmatprep.subr.bf16.mxu1 %v2154_v43 }
  0x8f   :  { %1160 = vmatprep.subr.bf16.mxu0 %v2123_v29 }
  0x91   :  { %1939 = vmatpush3.bf16.msra.mxu1 %v2155_v45 }
  0x92   :  { %1161 = vmatpush1.bf16.msra.mxu0 %v2121_v31  ;;  %1940 = vmatprep.subr.bf16.mxu1 %v2159_v47 }
  0x93   :  { %1162 = vmatprep.subr.bf16.mxu0 %v2128_v34 }
  0x95   :  { %1941 = vmatpush3.bf16.msra.mxu1 %v2160_v49 }
  0x96   :  { %1163 = vmatpush1.bf16.msra.mxu0 %v2126_v36  ;;  %1998 = vmatprep.subr.bf16.mxu1 %v2312_v0 }
  0x97   :  { %1164 = vmatprep.subr.bf16.mxu0 %v2133_v38 }
  0x9a   :  { %1165 = vmatpush1.bf16.msra.mxu0 %v2131_v40 }
  0x9b   :  { %1166 = vmatprep.subr.bf16.mxu0 %v2138_v42 }
  0x9e   :  { %1167 = vmatpush1.bf16.msra.mxu0 %v2136_v44 }
  0x9f   :  { %1168 = vmatprep.subr.bf16.mxu0 %v2143_v46 }
  0xa2   :  { %1169 = vmatpush1.bf16.msra.mxu0 %v2141_v48 }
  0xa3   :  { %1170 = vmatprep.subr.bf16.mxu0 %v2148_v50  ;;  %v327_v50 = vsub.s32 2, %v2490_v32  ;;  %v1874_v32 = vld [vmem:[%s2798_s9] ss:$0 sm:$0xff] }
  0xa6   :  { %1171 = vmatpush1.bf16.msra.mxu0 %v2146_v51 }
  0xa7   :  { %1172 = vmatprep.subr.bf16.mxu0 %v2153_v52 }
  0xaa   :  { %1173 = vmatpush1.bf16.msra.mxu0 %v2151_v53 }
  0xab   :  { %1174 = vmatprep.subr.bf16.mxu0 %v2158_v54 }
  0xae   :  { %1175 = vmatpush1.bf16.msra.mxu0 %v2156_v55 }
  0xaf   :  { %1176 = vmatprep.subr.bf16.mxu0 %v2163_v56 }
  0xb2   :  { %1177 = vmatpush1.bf16.msra.mxu0 %v2161_v57 }
  0xb3   :  { %1178 = vmatprep.subr.bf16.mxu0 %v2166_v58 }
  0xb6   :  { %1179 = vmatpush1.bf16.msra.mxu0 %v2164_v59  ;;  %v328_v59 = vrot.slane %v315_v6, %v327_v50 }
 0x12c   :  { %v187_v60 = vpop.f32.mrb[0].mxu0 }
 0x12d   :  { %v1996_v61 = vpop.f32.mrb[1].mxu0  ;;  %v188_v3 = vadd.f32 %v1747_v2, %v187_v60 }
 0x12e   :  { %v190_v63 = vpop.f32.mrb[2].mxu0 }
 0x12f   :  { %v1997_v1 = vpop.f32.mrb[3].mxu0  ;;  %v191_v4 = vadd.f32 %v1747_v2, %v190_v63  ;;  %2183 = vtanh.f32 %v188_v3 }
 0x131   :  { %2185 = vtanh.f32 %v191_v4 }
 0x139   :  { %v2611_v12 = vpop.eup %2183 }
 0x13a   :  { %v196_v17 = vrot.slane %v2611_v12, 4 }
 0x13b   :  { %v2613_v16 = vpop.eup %2185 }
 0x13c   :  { %v202_v19 = vrot.slane %v2613_v16, 4  ;;  %v197_v21 = vadd.f32 %v2611_v12, %v196_v17 }
 0x13e   :  { %v203_v24 = vadd.f32 %v2613_v16, %v202_v19  ;;  %v198_v29 = vrot.slane %v197_v21, 2 }
 0x140   :  { %v204_v33 = vrot.slane %v203_v24, 2  ;;  %v199_v37 = vadd.f32 %v198_v29, %v197_v21 }
 0x142   :  { %v205_v40 = vadd.f32 %v204_v33, %v203_v24  ;;  %v200_v41 = vrot.slane %v199_v37, 1 }
 0x144   :  { %v206_v42 = vrot.slane %v205_v40, 1  ;;  %v201_v43 = vadd.f32 %v200_v41, %v199_v37 }
 0x146   :  { %v207_v44 = vadd.f32 %v206_v42, %v205_v40  ;;  %v2624_v47 = vmul.f32 0.125, %v201_v43 }
 0x148   :  { %v2630_v51 = vmul.f32 0.125, %v207_v44 }
 0x14b   :  { %v622_v8 = vpop.f32.mrb[0].mxu1 }
 0x14c   :  { %v624_v9 = vpop.f32.mrb[1].mxu1  ;;  %v1920_v22 = vpop.f32.mrb[4].mxu0  ;;  %v623_v34 = vadd.f32 %v622_v8, %v320_v25 }
 0x14d   :  { %v625_v10 = vadd.f32 %v624_v9, %v324_v7  ;;  %v626_v11 = vpop.f32.mrb[2].mxu1  ;;  %v1921_v23 = vpop.f32.mrb[5].mxu0 }
 0x14e   :  { %v628_v13 = vpop.f32.mrb[3].mxu1  ;;  %v1922_v26 = vadd.f32 %v1921_v23, %v1920_v22  ;;  %v1923_v27 = vpop.f32.mrb[6].mxu0  ;;  %v627_v38 = vadd.f32 %v626_v11, %v320_v25 }
 0x14f   :  { %v1810_v14 = vmul.f32 -1.442695, %v625_v10  ;;  %v629_v15 = vadd.f32 %v628_v13, %v324_v7  ;;  %v1924_v28 = vpop.f32.mrb[7].mxu0 }
 0x150   :  { %v1925_v30 = vadd.f32 %v1924_v28, %v1923_v27  ;;  %v666_v2 = vadd.f32 %v1922_v26, %v328_v59 }
 0x151   :  { %2187 = vpow2.f32 %v1810_v14  ;;  %v1811_v18 = vmul.f32 -1.442695, %v629_v15 }
 0x152   :  { %v1812_v10 = vmul.f32 -1.442695, %v666_v2  ;;  %v669_v14 = vadd.f32 %v1925_v30, %v328_v59 }
 0x153   :  { %2189 = vpow2.f32 %v1811_v18 }
 0x154   :  { %v1813_v22 = vmul.f32 -1.442695, %v669_v14 }
 0x15b   :  { %v2188_v31 = vpop.eup %2187 }
 0x15c   :  { %v680_v35 = vadd.f32 1.0, %v2188_v31 }
 0x15d   :  { %v2190_v36 = vpop.eup %2189 }
 0x15e   :  { %2191 = vrcp.f32 %v680_v35  ;;  %v681_v39 = vadd.f32 1.0, %v2190_v36 }
 0x15f   :  { %2193 = vtanh.f32 %v623_v34 }
 0x160   :  { %2195 = vrcp.f32 %v681_v39 }
 0x161   :  { %2197 = vtanh.f32 %v627_v38 }
 0x162   :  { %2199 = vpow2.f32 %v1812_v10 }
 0x163   :  { %2201 = vpow2.f32 %v1813_v22 }
 0x168   :  { %v2622_v45 = vpop.eup %2191 }
 0x169   :  { %v2194_v46 = vpop.eup %2193  ;;  %v700_v48 = vsub.f32 1.0, %v2622_v45  ;;  %v698_v52 = vmul.f32 %v2622_v45, %v2624_v47 }
 0x16a   :  { %v2627_v49 = vpop.eup %2195 }
 0x16b   :  { %v701_v53 = vsub.f32 1.0, %v2627_v49  ;;  %v2635_v54 = vmul.f32 %v2194_v46, %v700_v48  ;;  %v2198_v55 = vpop.eup %2197  ;;  %v699_v56 = vmul.f32 %v2627_v49, %v2630_v51 }
 0x16c   :  { %v2200_v35 = vpop.eup %2199 }
 0x16d   :  { %v2639_v57 = vmul.f32 %v2198_v55, %v701_v53  ;;  %v704_v58 = vadd.f32 %v2635_v54, %v698_v52  ;;  %v692_v41 = vadd.f32 1.0, %v2200_v35  ;;  %v2202_v46 = vpop.eup %2201 }
 0x16e   :  { %v693_v53 = vadd.f32 1.0, %v2202_v46 }
 0x16f   :  { %v705_v60 = vadd.f32 %v2639_v57, %v699_v56  ;;  %v708_v61 = vrot.slane %v704_v58, 7  ;;  %2203 = vrcp.f32 %v692_v41 }
 0x170   :  { %2205 = vrcp.f32 %v693_v53 }
 0x171   :  { %v709_v63 = vrot.slane %v705_v60, 7  ;;  %v712_v1 = vmul.f32 %v2622_v45, %v708_v61 }
 0x173   :  { %v713_v3 = vmul.f32 %v2627_v49, %v709_v63  ;;  %v714_v4 = vadd.f32 %v712_v1, %v2635_v54 }
 0x175   :  { %v715_v7 = vadd.f32 %v713_v3, %v2639_v57  ;;  %v718_v8 = vrot.slane %v714_v4, 7  ;;  %v777_v9 = vsel %vm776_vm5, %v704_v58, %v714_v4 }
 0x177   :  { %v719_v11 = vrot.slane %v715_v7, 7  ;;  %v722_v6 = vmul.f32 %v2622_v45, %v718_v8  ;;  %v778_v13 = vsel %vm776_vm5, %v705_v60, %v715_v7 }
 0x179   :  { %v723_v15 = vmul.f32 %v2627_v49, %v719_v11  ;;  %v724_v17 = vadd.f32 %v722_v6, %v2635_v54  ;;  %v2204_v10 = vpop.eup %2203 }
 0x17b   :  { %v725_v18 = vadd.f32 %v723_v15, %v2639_v57  ;;  %v728_v19 = vrot.slane %v724_v17, 7  ;;  %v780_v21 = vsel %vm779_vm6, %v777_v9, %v724_v17  ;;  %v2206_v17 = vpop.eup %2205 }
 0x17d   :  { %v729_v23 = vrot.slane %v725_v18, 7  ;;  %v732_v24 = vmul.f32 %v2622_v45, %v728_v19  ;;  %v781_v25 = vsel %vm779_vm6, %v778_v13, %v725_v18 }
 0x17f   :  { %v733_v26 = vmul.f32 %v2627_v49, %v729_v23  ;;  %v734_v27 = vadd.f32 %v732_v24, %v2635_v54  ;;  %v2705_v23 = vpack.c.bf16 %v2611_v12, %v2611_v12  ;;  %v2718_v24 = vld [vmem:[%s2796_s7] sm:$0x7] }
 0x180   :  { %v884_v12 = vrot.slane %v2718_v24, %v323_v5  ;;  %v880_v5 = vrot.slane %v2718_v24, %v319_v20 }
 0x181   :  { %v735_v28 = vadd.f32 %v733_v26, %v2639_v57  ;;  %v738_v29 = vrot.slane %v734_v27, 7  ;;  %v783_v30 = vsel %vm782_vm7, %v780_v21, %v734_v27 }
 0x183   :  { %v739_v31 = vrot.slane %v735_v28, 7  ;;  %v742_v33 = vmul.f32 %v2622_v45, %v738_v29  ;;  %v784_v34 = vsel %vm782_vm7, %v781_v25, %v735_v28 }
 0x185   :  { %v743_v36 = vmul.f32 %v2627_v49, %v739_v31  ;;  %v744_v37 = vadd.f32 %v742_v33, %v2635_v54 }
 0x187   :  { %v745_v38 = vadd.f32 %v743_v36, %v2639_v57  ;;  %v748_v39 = vrot.slane %v744_v37, 7  ;;  %v786_v40 = vsel %vm785_vm8, %v783_v30, %v744_v37 }
 0x189   :  { %v749_v42 = vrot.slane %v745_v38, 7  ;;  %v752_v43 = vmul.f32 %v2622_v45, %v748_v39  ;;  %v787_v44 = vsel %vm785_vm8, %v784_v34, %v745_v38 }
 0x18b   :  { %v753_v48 = vmul.f32 %v2627_v49, %v749_v42  ;;  %v754_v52 = vadd.f32 %v752_v43, %v2635_v54 }
 0x18d   :  { %v755_v55 = vadd.f32 %v753_v48, %v2639_v57  ;;  %v758_v56 = vrot.slane %v754_v52, 7  ;;  %v789_v58 = vsel %vm788_vm9, %v786_v40, %v754_v52 }
 0x18f   :  { %v759_v59 = vrot.slane %v755_v55, 7  ;;  %v762_v60 = vmul.f32 %v2622_v45, %v758_v56  ;;  %v790_v61 = vsel %vm788_vm9, %v787_v44, %v755_v55 }
 0x191   :  { %v763_v63 = vmul.f32 %v2627_v49, %v759_v59  ;;  %v764_v1 = vadd.f32 %v762_v60, %v2635_v54 }
 0x193   :  { %v765_v2 = vadd.f32 %v763_v63, %v2639_v57  ;;  %v768_v3 = vrot.slane %v764_v1, 7  ;;  %v792_v4 = vsel %vm791_vm10, %v789_v58, %v764_v1 }
 0x195   :  { %v769_v7 = vrot.slane %v765_v2, 7  ;;  %v772_v8 = vmul.f32 %v2622_v45, %v768_v3  ;;  %v793_v9 = vsel %vm791_vm10, %v790_v61, %v765_v2 }
 0x197   :  { %v773_v11 = vmul.f32 %v2627_v49, %v769_v7  ;;  %v774_v6 = vadd.f32 %v772_v8, %v2635_v54 }
 0x199   :  { %v775_v13 = vadd.f32 %v773_v11, %v2639_v57  ;;  %v795_v14 = vsel %vm794_vm11, %v792_v4, %v774_v6 }
 0x19a   :  { %v797_v15 = vmul.f32 %v2204_v10, %v795_v14  ;;  %799 = vst [vmem:[%s2799_s10] sm:$0xff] %v795_v14 }
 0x19b   :  { %v796_v45 = vsel %vm794_vm11, %v793_v9, %v775_v13 }
 0x19c   :  { %v798_v18 = vmul.f32 %v2206_v17, %v796_v45  ;;  %800 = vst [vmem:[%s2799_s10 + $0x8] sm:$0xff] %v796_v45  ;;  %801 = vst [vmem:[%s2800_s11] sm:$0xff] %v797_v15  ;;  %v803_v49 = vrot.slane %v797_v15, 7 }
 0x19e   :  { %802 = vst [vmem:[%s2800_s11 + $0x8] sm:$0xff] %v798_v18  ;;  %v804_v54 = vrot.slane %v798_v18, 7  ;;  %v810_v57 = vpack.c.bf16 %v798_v18, %v797_v15 }
 0x1a0   :  { %1180 = vmatprep.mubr.bf16.mxu0 %v810_v57  ;;  %1223 = vmatprep.mubr.bf16.mxu1 %v810_v57  ;;  %v805_v19 = vsel %vm242_vm4, %v803_v49, %v804_v54  ;;  %v806_v21 = vsel %vm242_vm4, %v804_v54, %v803_v49 }
 0x1a1   :  { %v1863_v22 = vpack.c.bf16 %v805_v19, %v806_v21 }
 0x1a3   :  { %1864 = vmatmul.mubr.msk.bf16.vlgmr.msra.gmra.mrb[8].mxu0 %vm2564_vm3, %v1863_v22  ;;  %1867 = vmatmul.mubr.msk.bf16.vlgmr.msra.gmra.mrb[4].mxu1 %vm2564_vm3, %v1863_v22 }
 0x1a4   :  { %1999 = vmatpush3.bf16.xpose.msra.mxu1 %v2705_v23  ;;  %2000 = vmatprep.mubr.msk.bf16.mxu1 %vm2313_vm0, %v2312_v0 }
 0x1a5   :  { %2004 = vmatprep.subr.bf16.mxu1 %v2312_v0 }
 0x276   :  { %v1182_v25 = vpop.f32.mrb[8].mxu0  ;;  %v1942_v26 = vpop.f32.mrb[4].mxu1 }
 0x277   :  { %v1184_v62 = vpop.f32.mrb[9].mxu0  ;;  %v1943_v27 = vpop.f32.mrb[5].mxu1  ;;  %v1183_v40 = vadd.f32 %v1182_v25, %v880_v5 }
 0x278   :  { %v1185_v28 = vadd.f32 %v1184_v62, %v884_v12  ;;  %v2723_v29 = vadd.f32 %v1943_v27, %v1942_v26  ;;  %v1186_v30 = vpop.f32.mrb[10].mxu0  ;;  %v1945_v31 = vpop.f32.mrb[6].mxu1 }
 0x279   :  { %v1188_v33 = vpop.f32.mrb[11].mxu0  ;;  %v1946_v34 = vpop.f32.mrb[7].mxu1  ;;  %v1187_v43 = vadd.f32 %v1186_v30, %v880_v5 }
 0x27a   :  { %v1868_v35 = vmul.f32 -1.442695, %v1185_v28  ;;  %v1189_v36 = vadd.f32 %v1188_v33, %v884_v12  ;;  %v2725_v37 = vadd.f32 %v1946_v34, %v1945_v31 }
 0x27c   :  { %2207 = vpow2.f32 %v1868_v35  ;;  %v1869_v38 = vmul.f32 -1.442695, %v1189_v36 }
 0x27e   :  { %2209 = vpow2.f32 %v1869_v38 }
 0x286   :  { %v2208_v39 = vpop.eup %2207 }
 0x287   :  { %v1240_v41 = vadd.f32 1.0, %v2208_v39 }
 0x288   :  { %v2210_v42 = vpop.eup %2209 }
 0x289   :  { %2211 = vrcp.f32 %v1240_v41  ;;  %v1241_v44 = vadd.f32 1.0, %v2210_v42 }
 0x28a   :  { %2213 = vtanh.f32 %v1183_v40 }
 0x28b   :  { %2215 = vrcp.f32 %v1241_v44 }
 0x28c   :  { %2217 = vtanh.f32 %v1187_v43 }
 0x293   :  { %v2212_v46 = vpop.eup %2211 }
 0x294   :  { %v1260_v48 = vsub.f32 1.0, %v2212_v46  ;;  %v2214_v52 = vpop.eup %2213  ;;  %v1258_v55 = vmul.f32 %v2212_v46, %v2624_v47 }
 0x295   :  { %v2216_v53 = vpop.eup %2215 }
 0x296   :  { %v1262_v56 = vmul.f32 %v2214_v52, %v1260_v48  ;;  %v1261_v58 = vsub.f32 1.0, %v2216_v53  ;;  %v2218_v59 = vpop.eup %2217  ;;  %v1259_v60 = vmul.f32 %v2216_v53, %v2630_v51 }
 0x298   :  { %v1264_v20 = vadd.f32 %v1262_v56, %v1258_v55  ;;  %v1263_v61 = vmul.f32 %v2218_v59, %v1261_v58 }
 0x29a   :  { %v1268_v63 = vrot.slane %v1264_v20, 7  ;;  %v1265_v1 = vadd.f32 %v1263_v61, %v1259_v60 }
 0x29c   :  { %v1272_v2 = vmul.f32 %v2212_v46, %v1268_v63  ;;  %v1269_v3 = vrot.slane %v1265_v1, 7 }
 0x29e   :  { %v1274_v4 = vadd.f32 %v1272_v2, %v1262_v56  ;;  %v1273_v7 = vmul.f32 %v2216_v53, %v1269_v3 }
 0x2a0   :  { %v1278_v8 = vrot.slane %v1274_v4, 7  ;;  %v1336_v9 = vsel %vm776_vm5, %v1264_v20, %v1274_v4  ;;  %v1275_v10 = vadd.f32 %v1273_v7, %v1263_v61  ;;  %v2750_v7 = vpack.c.bf16 %v2613_v16, %v2613_v16 }
 0x2a1   :  { %v1463_v16 = vsel %vm785_vm8, %v2705_v23, 0 }
 0x2a2   :  { %v1282_v11 = vmul.f32 %v2212_v46, %v1278_v8  ;;  %v1279_v6 = vrot.slane %v1275_v10, 7  ;;  %v1337_v47 = vsel %vm776_vm5, %v1265_v1, %v1275_v10 }
 0x2a4   :  { %v1284_v13 = vadd.f32 %v1282_v11, %v1262_v56  ;;  %v1283_v14 = vmul.f32 %v2216_v53, %v1279_v6 }
 0x2a6   :  { %v1288_v15 = vrot.slane %v1284_v13, 7  ;;  %v1338_v51 = vsel %vm779_vm6, %v1336_v9, %v1284_v13  ;;  %v1285_v17 = vadd.f32 %v1283_v14, %v1263_v61 }
 0x2a8   :  { %v1292_v45 = vmul.f32 %v2212_v46, %v1288_v15  ;;  %v1289_v18 = vrot.slane %v1285_v17, 7  ;;  %v1339_v49 = vsel %vm779_vm6, %v1337_v47, %v1285_v17 }
 0x2aa   :  { %v1294_v54 = vadd.f32 %v1292_v45, %v1262_v56  ;;  %v1293_v57 = vmul.f32 %v2216_v53, %v1289_v18 }
 0x2ac   :  { %v1298_v19 = vrot.slane %v1294_v54, 7  ;;  %v1340_v21 = vsel %vm782_vm7, %v1338_v51, %v1294_v54  ;;  %v1295_v22 = vadd.f32 %v1293_v57, %v1263_v61 }
 0x2ae   :  { %v1302_v12 = vmul.f32 %v2212_v46, %v1298_v19  ;;  %v1299_v25 = vrot.slane %v1295_v22, 7  ;;  %v1341_v26 = vsel %vm782_vm7, %v1339_v49, %v1295_v22  ;;  %v2167_v22 = vld [vmem:[#allocation6 + $0x40] sm:$0xff]  }
 0x2af   :  { %1956 = vmatprep.subr.bf16.mxu0 %v2167_v22 }
 0x2b0   :  { %v1304_v62 = vadd.f32 %v1302_v12, %v1262_v56  ;;  %v1303_v27 = vmul.f32 %v2216_v53, %v1299_v25  ;;  %v2168_v12 = vld [vmem:[#allocation6] sm:$0xff]   ;;  %v2169_v25 = vld [vmem:[#allocation6 + $0x48] sm:$0xff]  }
 0x2b1   :  { %1957 = vmatpush3.bf16.msra.mxu0 %v2168_v12 }
 0x2b2   :  { %v1308_v28 = vrot.slane %v1304_v62, 7  ;;  %v1342_v30 = vsel %vm785_vm8, %v1340_v21, %v1304_v62  ;;  %v1305_v31 = vadd.f32 %v1303_v27, %v1263_v61  ;;  %1958 = vmatprep.subr.bf16.mxu0 %v2169_v25  ;;  %v2171_v62 = vld [vmem:[#allocation6 + $0x50] sm:$0xff]  }
 0x2b3   :  { %v2172_v27 = vld [vmem:[#allocation6 + $0x10] sm:$0xff]  }
 0x2b4   :  { %v1312_v33 = vmul.f32 %v2212_v46, %v1308_v28  ;;  %v1309_v34 = vrot.slane %v1305_v31, 7  ;;  %v1343_v35 = vsel %vm785_vm8, %v1341_v26, %v1305_v31  ;;  %v2170_v26 = vld [vmem:[#allocation6 + $0x8] sm:$0xff]   ;;  %v2173_v28 = vld [vmem:[#allocation6 + $0x58] sm:$0xff]   ;;  %v2175_v31 = vld [vmem:[#allocation6 + $0x60] sm:$0xff]  }
 0x2b5   :  { %1959 = vmatpush3.bf16.msra.mxu0 %v2170_v26 }
 0x2b6   :  { %v1314_v36 = vadd.f32 %v1312_v33, %v1262_v56  ;;  %v1313_v38 = vmul.f32 %v2216_v53, %v1309_v34  ;;  %1960 = vmatprep.subr.bf16.mxu0 %v2171_v62  ;;  %v2176_v33 = vld [vmem:[#allocation6 + $0x20] sm:$0xff]   ;;  %v2177_v34 = vld [vmem:[#allocation6 + $0x68] sm:$0xff]  }
 0x2b8   :  { %v1318_v5 = vrot.slane %v1314_v36, 7  ;;  %v1344_v39 = vsel %vm788_vm9, %v1342_v30, %v1314_v36  ;;  %v1315_v40 = vadd.f32 %v1313_v38, %v1263_v61  ;;  %v2174_v30 = vld [vmem:[#allocation6 + $0x18] sm:$0xff]  }
 0x2b9   :  { %1961 = vmatpush3.bf16.msra.mxu0 %v2172_v27 }
 0x2ba   :  { %v1322_v41 = vmul.f32 %v2212_v46, %v1318_v5  ;;  %v1319_v42 = vrot.slane %v1315_v40, 7  ;;  %v1345_v43 = vsel %vm788_vm9, %v1343_v35, %v1315_v40  ;;  %1962 = vmatprep.subr.bf16.mxu0 %v2173_v28  ;;  %v1509_v40 = vsel %vm785_vm8, %v2750_v7, 0 }
 0x2bc   :  { %v1324_v44 = vadd.f32 %v1322_v41, %v1262_v56  ;;  %v1323_v48 = vmul.f32 %v2216_v53, %v1319_v42 }
 0x2bd   :  { %1963 = vmatpush3.bf16.msra.mxu0 %v2174_v30 }
 0x2be   :  { %v1328_v52 = vrot.slane %v1324_v44, 7  ;;  %v1346_v55 = vsel %vm791_vm10, %v1344_v39, %v1324_v44  ;;  %v1325_v58 = vadd.f32 %v1323_v48, %v1263_v61  ;;  %1964 = vmatprep.subr.bf16.mxu0 %v2175_v31  ;;  %v2178_v44 = vld [vmem:[#allocation6 + $0x28] sm:$0xff]   ;;  %v2179_v48 = vld [vmem:[#allocation6 + $0x70] sm:$0xff]  }
 0x2c0   :  { %v1332_v59 = vmul.f32 %v2212_v46, %v1328_v52  ;;  %v1329_v20 = vrot.slane %v1325_v58, 7  ;;  %v1347_v60 = vsel %vm791_vm10, %v1345_v43, %v1325_v58  ;;  %v2180_v52 = vld [vmem:[#allocation6 + $0x30] sm:$0xff]   ;;  %v2182_v58 = vld [vmem:[#allocation6 + $0x38] sm:$0xff]  }
 0x2c1   :  { %1965 = vmatpush3.bf16.msra.mxu0 %v2176_v33 }
 0x2c2   :  { %v1334_v63 = vadd.f32 %v1332_v59, %v1262_v56  ;;  %v1333_v1 = vmul.f32 %v2216_v53, %v1329_v20  ;;  %1966 = vmatprep.subr.bf16.mxu0 %v2177_v34 }
 0x2c4   :  { %v1348_v2 = vsel %vm794_vm11, %v1346_v55, %v1334_v63  ;;  %v1335_v4 = vadd.f32 %v1333_v1, %v1263_v61  ;;  %v2181_v55 = vld [vmem:[#allocation6 + $0x78] sm:$0xff]  }
 0x2c5   :  { %v1352_v3 = vpack.c.bf16 %v1348_v2, %v1348_v2  ;;  %1891 = vst [vmem:[%s2799_s10 + $0x10] sm:$0xff] %v1348_v2  ;;  %1967 = vmatpush3.bf16.msra.mxu0 %v2178_v44 }
 0x2c6   :  { %v1349_v46 = vsel %vm794_vm11, %v1347_v60, %v1335_v4  ;;  %1968 = vmatprep.subr.bf16.mxu0 %v2179_v48 }
 0x2c7   :  { %2001 = vmatmul.mubr.bf16.vlgmr.msra.gmra.mrb[8].mxu1 %v1352_v3  ;;  %v1552_v8 = vpack.c.bf16 %v1349_v46, %v1348_v2  ;;  %1892 = vst [vmem:[%s2799_s10 + $0x18] sm:$0xff] %v1349_v46  ;;  %v1353_v53 = vpack.c.bf16 %v1349_v46, %v1349_v46 }
 0x2c8   :  { %2005 = vmatpush3.bf16.xpose.msra.mxu1 %v2750_v7  ;;  %2006 = vmatprep.mubr.msk.bf16.mxu1 %vm2313_vm0, %v2312_v0  ;;  %v888_v7 = vrot.slane %v2718_v24, %v327_v50 }
 0x2c9   :  { %2010 = vmatprep.subr.bf16.mxu1 %v2312_v0  ;;  %1720 = vmatprep.mubr.bf16.mxu0 %v1552_v8 }
 0x2ca   :  { %1969 = vmatpush3.bf16.msra.mxu0 %v2180_v52  ;;  %v1226_v46 = vadd.f32 %v2723_v29, %v888_v7  ;;  %v1229_v8 = vadd.f32 %v2725_v37, %v888_v7 }
 0x2cb   :  { %1970 = vmatprep.subr.bf16.mxu0 %v2181_v55 }
 0x2ce   :  { %1971 = vmatpush3.bf16.msra.mxu0 %v2182_v58 }
 0x2cf   :  { %2007 = vmatmul.mubr.bf16.vlgmr.msra.gmra.mrb[12].mxu1 %v1353_v53  ;;  %v1870_v53 = vmul.f32 -1.442695, %v1226_v46 }
 0x2d0   :  { %2011 = vmatpush3.bf16.msra.mxu1 %v1463_v16  ;;  %2012 = vmatprep.mubr.msk.bf16.mxu1 %vm2313_vm0, %v2312_v0  ;;  %v1871_v16 = vmul.f32 -1.442695, %v1229_v8 }
 0x2d1   :  { %2016 = vmatprep.subr.bf16.mxu1 %v2312_v0 }
 0x39a   :  { %v1388_v56 = vpop.f32.mrb[8].mxu1 }
 0x39b   :  { %v2002_v61 = vpop.f32.mrb[9].mxu1  ;;  %v1435_v9 = vsel %vm1434_vm12, %v1388_v56, -inf }
 0x39c   :  { %1436 = vmax.xlane.f32.xlu0 %v1435_v9  ;;  %v1391_v10 = vpop.f32.mrb[10].mxu1 }
 0x39d   :  { %v2003_v11 = vpop.f32.mrb[11].mxu1 }
 0x3a2   :  { %v1428_v6 = vpop.f32.mrb[12].mxu1 }
 0x3a3   :  { %v2008_v47 = vpop.f32.mrb[13].mxu1  ;;  %v1438_v13 = vsel %vm1434_vm12, %v1428_v6, -inf }
 0x3a4   :  { %1439 = vmax.xlane.f32.xlu0 %v1438_v13  ;;  %v1431_v23 = vpop.f32.mrb[14].mxu1 }
 0x3a5   :  { %v2009_v14 = vpop.f32.mrb[15].mxu1 }
 0x429   :  { %v1437_v15 = vpop.xlane.xlu0 %1436 }
 0x42a   :  { %v1441_v51 = vsub.f32 %v1388_v56, %v1437_v15 }
 0x42c   :  { %v1443_v17 = vmul.f32 1.442695, %v1441_v51 }
 0x42e   :  { %2219 = vpow2.f32 %v1443_v17 }
 0x431   :  { %v1440_v45 = vpop.xlane.xlu0 %1439 }
 0x432   :  { %v1442_v18 = vsub.f32 %v1428_v6, %v1440_v45 }
 0x434   :  { %v1445_v49 = vmul.f32 1.442695, %v1442_v18 }
 0x436   :  { %2221 = vpow2.f32 %v1445_v49 }
 0x438   :  { %v2220_v54 = vpop.eup %2219 }
 0x439   :  { %v1447_v57 = vsel %vm1434_vm12, %v2220_v54, 0.0 }
 0x43a   :  { %1448 = vadd.xlane.f32.xlu1 %v1447_v57 }
 0x440   :  { %v2222_v19 = vpop.eup %2221 }
 0x441   :  { %v1450_v21 = vsel %vm1434_vm12, %v2222_v19, 0.0 }
 0x442   :  { %1451 = vadd.xlane.f32.xlu1 %v1450_v21 }
 0x4c7   :  { %v1449_v35 = vpop.xlane.xlu1 %1448 }
 0x4c8   :  { %2223 = vrcp.f32 %v1449_v35 }
 0x4cf   :  { %v1452_v36 = vpop.xlane.xlu1 %1451 }
 0x4d0   :  { %2225 = vrcp.f32 %v1452_v36 }
 0x4d1   :  { %2227 = vpow2.f32 %v1870_v53 }
 0x4d2   :  { %v2224_v38 = vpop.eup %2223  ;;  %2229 = vpow2.f32 %v1871_v16 }
 0x4d3   :  { %v1455_v5 = vmul.f32 %v2224_v38, %v2220_v54 }
 0x4d5   :  { %v1457_v39 = vpack.c.bf16 %v1455_v5, %v1455_v5 }
 0x4d7   :  { %2013 = vmatmul.mubr.msk.bf16.vlgmr.msra.gmra.mrb[16].mxu1 %vm1434_vm12, %v1457_v39 }
 0x4d8   :  { %2017 = vmatpush3.bf16.msra.mxu1 %v1509_v40  ;;  %2018 = vmatprep.mubr.msk.bf16.mxu1 %vm2313_vm0, %v2312_v0 }
 0x4da   :  { %v2226_v41 = vpop.eup %2225 }
 0x4db   :  { %v1456_v42 = vmul.f32 %v2226_v41, %v2222_v19  ;;  %v2228_v56 = vpop.eup %2227 }
 0x4dc   :  { %v2230_v61 = vpop.eup %2229  ;;  %v1252_v9 = vadd.f32 1.0, %v2228_v56 }
 0x4dd   :  { %v1458_v43 = vpack.c.bf16 %v1456_v42, %v1456_v42  ;;  %v1253_v10 = vadd.f32 1.0, %v2230_v61 }
 0x4de   :  { %2231 = vrcp.f32 %v1252_v9 }
 0x4df   :  { %2019 = vmatmul.mubr.msk.bf16.vlgmr.msra.gmra.mrb[20].mxu1 %vm1434_vm12, %v1458_v43  ;;  %2233 = vrcp.f32 %v1253_v10 }
 0x4e8   :  { %v2232_v13 = vpop.eup %2231 }
 0x4e9   :  { %v2234_v15 = vpop.eup %2233 }
 0x5aa   :  { %v1499_v59 = vpop.f32.mrb[16].mxu1 }
 0x5ab   :  { %v2014_v20 = vpop.f32.mrb[17].mxu1 }
 0x5ac   :  { %v1502_v60 = vpop.f32.mrb[18].mxu1 }
 0x5ad   :  { %v2015_v63 = vpop.f32.mrb[19].mxu1 }
 0x5b2   :  { %v1545_v0 = vpop.f32.mrb[20].mxu1 }
 0x5b3   :  { %v1551_v1 = vpack.c.bf16 %v1545_v0, %v1499_v59  ;;  %v2020_v2 = vpop.f32.mrb[21].mxu1 }
 0x5b4   :  { %v1548_v3 = vpop.f32.mrb[22].mxu1 }
 0x5b5   :  { %v2021_v4 = vpop.f32.mrb[23].mxu1  ;;  %1721 = vmatmul.mubr.bf16.vlgmr.msra.gmra.mrb[12].mxu0 %v1551_v1 }
 0x688   :  { %v1972_v11 = vpop.f32.mrb[12].mxu0 }
 0x689   :  { %v1973_v50 = vpop.f32.mrb[13].mxu0 }
 0x68a   :  { %v1974_v24 = vadd.f32 %v1973_v50, %v1972_v11  ;;  %v1975_v29 = vpop.f32.mrb[14].mxu0 }
 0x68b   :  { %v1976_v6 = vpop.f32.mrb[15].mxu0 }
 0x68c   :  { %v1723_v37 = vadd.f32 %v1974_v24, %v1874_v32  ;;  %v1977_v47 = vadd.f32 %v1976_v6, %v1975_v29 }
 0x68e   :  { %v1729_v23 = vmul.f32 %v2232_v13, %v1723_v37  ;;  %v1726_v14 = vadd.f32 %v1977_v47, %v1874_v32 }
 0x690   :  { %1893 = vst [vmem:[%s2800_s11 + $0x10] sm:$0xff] %v1729_v23  ;;  %v1730_v51 = vmul.f32 %v2234_v15, %v1726_v14 }
 0x692   :  { %1894 = vst [vmem:[%s2800_s11 + $0x18] sm:$0xff] %v1730_v51 }
 0x693   :  { %1745 = vsyncpa [#allocation3], 1 }
 0x694   :  { %1746 = vsyncpa [#allocation5], 1 }

</bundles_post_ra>
